<compile_context>
chip_gen: v5e
topology: v5e:2x2
jax: 0.10.0
libtpu: 0.0.40
codegen_flags: <defaults>
</compile_context>

<pallas_src>
import math
import functools

import jax
import jax.numpy as jnp
from jax.experimental import pallas as pl
from jax.experimental.pallas import tpu as pltpu

LN_EPS = 1e-5  # PyTorch nn.LayerNorm default


def _layer_norm(v, gamma, beta):
    mu = jnp.mean(v, axis=-1, keepdims=True)
    var = jnp.mean(jnp.square(v - mu), axis=-1, keepdims=True)
    return (v - mu) * jax.lax.rsqrt(var + LN_EPS) * gamma + beta


def _gelu_exact(x):
    # nn.GELU() default is the exact erf formulation.
    return 0.5 * x * (1.0 + jax.lax.erf(x * (1.0 / math.sqrt(2.0))))


def block_kernel(x_ref, kv_ref,
                 g1_ref, b1_ref,
                 wq_ref, wk_ref, wv_ref, bq_ref, bk_ref, bv_ref,
                 wo_ref, bo_ref,
                 g2_ref, b2_ref,
                 w1_ref, fb1_ref, w2_ref, fb2_ref,
                 o_ref,
                 attn_scr,
                 *, num_heads, compute_dtype):
    Bt, Lq, D = x_ref.shape
    Lk = kv_ref.shape[1]
    hd = D // num_heads
    scale = 1.0 / math.sqrt(hd)
    cd = compute_dtype
    f32 = jnp.float32

    # Flatten the batch block into rows: all row-wise ops (LayerNorm, projections, MLP)
    # see a (Bt*Lq, D) slab, filling the MXU M dimension.
    x = x_ref[...].reshape(Bt * Lq, D).astype(f32)
    kv = kv_ref[...].reshape(Bt * Lk, D).astype(f32)

    g1 = g1_ref[0].astype(f32)
    b1 = b1_ref[0].astype(f32)
    q_in = _layer_norm(x, g1, b1)      # norm1 on query input
    kv_in = _layer_norm(kv, g1, b1)    # norm1 on key/value input (same norm1 weights)

    # QKV projections.  Weights arrive pre-transposed and pre-cast to compute_dtype in
    # the wrapper; accumulation is f32.  q is pre-scaled (bias included), matching
    # nn.MultiheadAttention's query scaling, so the score matrix needs no extra scaling.
    q = (jnp.dot(q_in.astype(cd), wq_ref[...],
                 preferred_element_type=f32) + bq_ref[0].astype(f32)) * scale
    k = jnp.dot(kv_in.astype(cd), wk_ref[...],
                preferred_element_type=f32) + bk_ref[0].astype(f32)
    v = jnp.dot(kv_in.astype(cd), wv_ref[...],
                preferred_element_type=f32) + bv_ref[0].astype(f32)

    q3 = q.reshape(Bt, Lq, D)
    k3 = k.reshape(Bt, Lk, D)
    v3 = v.reshape(Bt, Lk, D)

    # Per-head attention, batched over the Bt batch block (single short static head loop,
    # no Python batch loop / concatenate).  Head results land in a (Bt*Lq, D) f32 VMEM
    # scratch so a single K=D output-projection matmul can follow.
    # TODO(synk): no key_padding_mask / attn_mask path (the PyTorch forward never passes masks).
    for h in range(num_heads):
        sl = slice(h * hd, (h + 1) * hd)
        qh = q3[:, :, sl].astype(cd)                        # (Bt, Lq, hd)
        kh = k3[:, :, sl].astype(cd)                        # (Bt, Lk, hd)
        vh = v3[:, :, sl].astype(cd)                        # (Bt, Lk, hd)
        s = jnp.einsum("bqd,bkd->bqk", qh, kh,
                       preferred_element_type=f32)          # (Bt, Lq, Lk)
        m = jnp.max(s, axis=-1, keepdims=True)
        p = jnp.exp(s - m)                                  # unnormalized probs
        l = jnp.sum(p, axis=-1, keepdims=True)
        pv = jnp.einsum("bqk,bkd->bqd", p.astype(cd), vh,
                        preferred_element_type=f32)         # (Bt, Lq, hd)
        pv = pv / l                                         # exact softmax normalization
        attn_scr[:, sl] = pv.reshape(Bt * Lq, hd)

    attn = attn_scr[...]                                    # (Bt*Lq, D) f32
    attn_out = jnp.dot(attn.astype(cd), wo_ref[...],
                       preferred_element_type=f32) + bo_ref[0].astype(f32)

    # residual 1 (dropout / drop_path are identity in eval mode)
    x1 = x + attn_out

    # MLP on norm2(x1) over the flattened row slab (GELU / bias math in f32)
    y = _layer_norm(x1, g2_ref[0].astype(f32), b2_ref[0].astype(f32))
    hid = jnp.dot(y.astype(cd), w1_ref[...],
                  preferred_element_type=f32) + fb1_ref[0].astype(f32)
    hid = _gelu_exact(hid)
    y2 = jnp.dot(hid.astype(cd), w2_ref[...],
                 preferred_element_type=f32) + fb2_ref[0].astype(f32)

    # residual 2
    o_ref[...] = (x1 + y2).reshape(Bt, Lq, D).astype(o_ref.dtype)


def _tpu_generation():
    try:
        kind = jax.devices()[0].device_kind.lower()
    except Exception:
        return None
    if "v7" in kind or "7x" in kind:
        return 7
    for tag, gen in (("v6", 6), ("v5", 5), ("v4", 4)):
        if tag in kind:
            return gen
    return None


def _vmem_capacity_bytes(gen):
    try:
        cap = int(pltpu.get_tpu_info().vmem_capacity_bytes)
        if cap > 0:
            return cap
    except Exception:
        pass
    return (64 << 20) if gen == 7 else (128 << 20)


def _choose_block_b(B, Lq, target_rows, prefer_even_grid):
    """Largest divisor Bt of B with Bt*Lq <= target_rows; on v7x prefer an even grid."""
    cands = [bt for bt in range(1, B + 1)
             if B % bt == 0 and bt * Lq <= max(target_rows, Lq)]
    if prefer_even_grid:
        even = [bt for bt in cands if (B // bt) % 2 == 0]
        if even:
            return max(even)
    return max(cands)


def cross_attention_encoder_block(x, inputs_kv, params, num_heads, *,
                                  block_b=None, compute_dtype=jnp.bfloat16):
    B, Lq, D = x.shape
    Lk = inputs_kv.shape[1]
    mlp_dim = params["w1"].shape[1]
    assert D % num_heads == 0

    gen = _tpu_generation()
    if block_b is None:
        target_rows = 128 if gen == 5 else 256            # v5e MXU is 128x128
        block_b = _choose_block_b(B, Lq, target_rows, prefer_even_grid=(gen == 7))
    Bt = block_b
    assert B % Bt == 0, "block_b must divide the batch size"
    grid = (B // Bt,)

    cd = jnp.dtype(compute_dtype)
    f32 = jnp.float32

    # Matmul weights pre-cast once in the wrapper; LN / bias parameters stay f32.
    wq = params["wq"].astype(cd); wk = params["wk"].astype(cd)
    wv = params["wv"].astype(cd); wo = params["wo"].astype(cd)
    w1 = params["w1"].astype(cd); w2 = params["w2"].astype(cd)
    ln_bias = {k: params[k].astype(f32) for k in
               ("g1", "b1", "bq", "bk", "bv", "bo", "g2", "b2", "fb1", "fb2")}

    args = (x, inputs_kv,
            ln_bias["g1"], ln_bias["b1"],
            wq, wk, wv,
            ln_bias["bq"], ln_bias["bk"], ln_bias["bv"],
            wo, ln_bias["bo"],
            ln_bias["g2"], ln_bias["b2"],
            w1, ln_bias["fb1"], w2, ln_bias["fb2"])

    def resident(shape):
        # Constant block index -> the pipeline fetches these once and keeps them resident.
        return pl.BlockSpec(shape, lambda i, _n=len(shape): (0,) * _n)

    # TODO(synk): for ViT-L/H-scale mlp_dim on v7x (64 MiB VMEM), stream W1/W2 in chunks
    # (extra grid axis or pltpu.emit_pipeline) instead of keeping them resident.
    in_specs = [
        pl.BlockSpec((Bt, Lq, D), lambda i: (i, 0, 0)),   # x
        pl.BlockSpec((Bt, Lk, D), lambda i: (i, 0, 0)),   # inputs_kv
        resident((1, D)), resident((1, D)),               # norm1 gamma/beta
        resident((D, D)), resident((D, D)), resident((D, D)),   # Wq^T, Wk^T, Wv^T
        resident((1, D)), resident((1, D)), resident((1, D)),   # bq, bk, bv
        resident((D, D)), resident((1, D)),               # Wo^T, bo
        resident((1, D)), resident((1, D)),               # norm2 gamma/beta
        resident((D, mlp_dim)), resident((1, mlp_dim)),   # fc1 W^T, b
        resident((mlp_dim, D)), resident((1, D)),         # fc2 W^T, b
    ]
    out_specs = pl.BlockSpec((Bt, Lq, D), lambda i: (i, 0, 0))

    # Generation-aware VMEM budget: resident weights (double-buffered by the pipeline)
    # + double-buffered activation blocks + in-kernel f32 temporaries + headroom,
    # capped below the chip's physical per-core VMEM (64 MiB on v7x, 128 MiB otherwise).
    w_bytes = 2 * sum(int(a.size) * a.dtype.itemsize for a in args[2:])
    io_bytes = 2 * (2 * Bt * Lq * D + Bt * Lk * D) * x.dtype.itemsize
    tmp_bytes = 4 * (2 * Bt * Lq * mlp_dim + 8 * Bt * Lq * D
                     + 4 * Bt * Lk * D + 2 * Bt * Lq * Lk)
    cap = _vmem_capacity_bytes(gen)
    vmem_limit = int(min(max(w_bytes + io_bytes + tmp_bytes + (8 << 20), 32 << 20),
                         cap - (8 << 20)))

    flops = int(2 * B * Lq * D * D            # Q projection
                + 4 * B * Lk * D * D          # K, V projections
                + 4 * B * Lq * Lk * D         # scores + PV
                + 2 * B * Lq * D * D          # output projection
                + 4 * B * Lq * D * mlp_dim)   # fc1 + fc2
    transcendentals = int(B * Lq * Lk * num_heads      # exp
                          + B * Lq * mlp_dim           # erf
                          + B * (2 * Lq + 2 * Lk))     # rsqrt in the LayerNorms
    bytes_accessed = int(sum(int(a.size) * a.dtype.itemsize for a in args)
                         + B * Lq * D * x.dtype.itemsize)

    kernel = functools.partial(block_kernel, num_heads=num_heads, compute_dtype=cd)
    return pl.pallas_call(
        kernel,
        out_shape=jax.ShapeDtypeStruct((B, Lq, D), x.dtype),
        grid_spec=pltpu.PrefetchScalarGridSpec(
            num_scalar_prefetch=0,
            grid=grid,
            in_specs=in_specs,
            out_specs=out_specs,
            scratch_shapes=[pltpu.VMEM((Bt * Lq, D), jnp.float32)],
        ),
        compiler_params=pltpu.CompilerParams(
            dimension_semantics=("parallel",),   # batch blocks are independent
            vmem_limit_bytes=vmem_limit,
        ),
        cost_estimate=pl.CostEstimate(flops=flops,
                                      transcendentals=transcendentals,
                                      bytes_accessed=bytes_accessed),
    )(*args)


def make_params(key, dim, mlp_dim, dtype=jnp.float32):
    ks = jax.random.split(key, 16)

    def n(k, s, sc=0.05):
        return (sc * jax.random.normal(k, s, dtype=jnp.float32)).astype(dtype)

    return dict(
        g1=(1.0 + 0.1 * jax.random.normal(ks[0], (1, dim))).astype(dtype),
        b1=n(ks[1], (1, dim)),
        wq=n(ks[2], (dim, dim)),   # stored pre-transposed: y = x @ Wq^T
        wk=n(ks[3], (dim, dim)),
        wv=n(ks[4], (dim, dim)),
        bq=n(ks[5], (1, dim), 0.01),
        bk=n(ks[6], (1, dim), 0.01),
        bv=n(ks[7], (1, dim), 0.01),
        wo=n(ks[8], (dim, dim)),
        bo=n(ks[9], (1, dim), 0.01),
        g2=(1.0 + 0.1 * jax.random.normal(ks[10], (1, dim))).astype(dtype),
        b2=n(ks[11], (1, dim)),
        w1=n(ks[12], (dim, mlp_dim)),
        fb1=n(ks[13], (1, mlp_dim), 1e-3),
        w2=n(ks[14], (mlp_dim, dim)),
        fb2=n(ks[15], (1, dim), 1e-3),
    )


def reference(x, kv, params, num_heads):
    """Pure-JAX reference mirroring the PyTorch forward (eval mode)."""
    def ln(v, g, b):
        mu = v.mean(-1, keepdims=True)
        var = ((v - mu) ** 2).mean(-1, keepdims=True)
        return (v - mu) / jnp.sqrt(var + LN_EPS) * g + b

    B, Lq, D = x.shape
    Lk = kv.shape[1]
    hd = D // num_heads
    g1, b1 = params["g1"][0], params["b1"][0]
    q_in, kv_in = ln(x, g1, b1), ln(kv, g1, b1)
    q = q_in @ params["wq"] + params["bq"][0]
    k = kv_in @ params["wk"] + params["bk"][0]
    v = kv_in @ params["wv"] + params["bv"][0]
    qh = q.reshape(B, Lq, num_heads, hd)
    kh = k.reshape(B, Lk, num_heads, hd)
    vh = v.reshape(B, Lk, num_heads, hd)
    s = jnp.einsum("bqhd,bkhd->bhqk", qh, kh) / math.sqrt(hd)
    p = jax.nn.softmax(s, axis=-1)
    a = jnp.einsum("bhqk,bkhd->bqhd", p, vh).reshape(B, Lq, D)
    attn_out = a @ params["wo"] + params["bo"][0]
    x1 = x + attn_out
    y = ln(x1, params["g2"][0], params["b2"][0])
    h = y @ params["w1"] + params["fb1"][0]
    h = 0.5 * h * (1.0 + jax.lax.erf(h / math.sqrt(2.0)))
    y2 = h @ params["w2"] + params["fb2"][0]
    return x1 + y2


if __name__ == "__main__":
    # Small but lane-dense shapes (D multiple of 128); block_b=2 -> grid of 2 steps.
    B, Lq, Lk, D, H, MLP = 4, 8, 16, 128, 4, 256
    key = jax.random.PRNGKey(0)
    kx, kkv, kp = jax.random.split(key, 3)
    x = jax.random.normal(kx, (B, Lq, D), dtype=jnp.float32)
    inputs_kv = jax.random.normal(kkv, (B, Lk, D), dtype=jnp.float32)
    params = make_params(kp, D, MLP)

    ref = reference(x, inputs_kv, params, H)

    # f32 compute path: tight check against the f32 reference.
    out_f32 = cross_attention_encoder_block(x, inputs_kv, params, H,
                                            block_b=2, compute_dtype=jnp.float32)
    out_f32 = jax.block_until_ready(out_f32)
    assert out_f32.shape == (B, Lq, D)
    err32 = float(jnp.max(jnp.abs(out_f32 - ref)))
    assert jnp.allclose(out_f32, ref, atol=5e-3, rtol=5e-3), f"f32 max abs err {err32}"

    # Default path (bf16 matmul operands, f32 accumulation): looser sanity check.
    out_bf16 = cross_attention_encoder_block(x, inputs_kv, params, H)
    out_bf16 = jax.block_until_ready(out_bf16)
    err16 = float(jnp.max(jnp.abs(out_bf16 - ref)))
    assert err16 < 5e-2, f"bf16 max abs err {err16}"

    print("KERNEL_OK")
</pallas_src>

<mosaic_0001>
module attributes {stable_mosaic.version = 11 : i64} {
  func.func @block_kernel(%arg0: i32, %arg1: memref<2x8x128xf32, #tpu.memory_space<vmem>>, %arg2: memref<2x16x128xf32, #tpu.memory_space<vmem>>, %arg3: memref<1x128xf32, #tpu.memory_space<vmem>>, %arg4: memref<1x128xf32, #tpu.memory_space<vmem>>, %arg5: memref<128x128xf32, #tpu.memory_space<vmem>>, %arg6: memref<128x128xf32, #tpu.memory_space<vmem>>, %arg7: memref<128x128xf32, #tpu.memory_space<vmem>>, %arg8: memref<1x128xf32, #tpu.memory_space<vmem>>, %arg9: memref<1x128xf32, #tpu.memory_space<vmem>>, %arg10: memref<1x128xf32, #tpu.memory_space<vmem>>, %arg11: memref<128x128xf32, #tpu.memory_space<vmem>>, %arg12: memref<1x128xf32, #tpu.memory_space<vmem>>, %arg13: memref<1x128xf32, #tpu.memory_space<vmem>>, %arg14: memref<1x128xf32, #tpu.memory_space<vmem>>, %arg15: memref<128x256xf32, #tpu.memory_space<vmem>>, %arg16: memref<1x256xf32, #tpu.memory_space<vmem>>, %arg17: memref<256x128xf32, #tpu.memory_space<vmem>>, %arg18: memref<1x128xf32, #tpu.memory_space<vmem>>, %arg19: memref<2x8x128xf32, #tpu.memory_space<vmem>>, %arg20: memref<16x128xf32, #tpu.memory_space<vmem>>) attributes {dimension_semantics = [#tpu.dimension_semantics<parallel>], iteration_bounds = array<i64: 2>, scalar_prefetch = 0 : i64, scratch_operands = 1 : i64, tpu.core_type = #tpu.core_type<tc>, window_params = [{transform_indices = @transform_0, window_bounds = array<i64: 2, 8, 128>}, {transform_indices = @transform_1, window_bounds = array<i64: 2, 16, 128>}, {pipeline_mode = #tpu.pipeline_mode<synchronous>, transform_indices = @transform_2, window_bounds = array<i64: 1, 128>}, {pipeline_mode = #tpu.pipeline_mode<synchronous>, transform_indices = @transform_3, window_bounds = array<i64: 1, 128>}, {pipeline_mode = #tpu.pipeline_mode<synchronous>, transform_indices = @transform_4, window_bounds = array<i64: 128, 128>}, {pipeline_mode = #tpu.pipeline_mode<synchronous>, transform_indices = @transform_5, window_bounds = array<i64: 128, 128>}, {pipeline_mode = #tpu.pipeline_mode<synchronous>, transform_indices = @transform_6, window_bounds = array<i64: 128, 128>}, {pipeline_mode = #tpu.pipeline_mode<synchronous>, transform_indices = @transform_7, window_bounds = array<i64: 1, 128>}, {pipeline_mode = #tpu.pipeline_mode<synchronous>, transform_indices = @transform_8, window_bounds = array<i64: 1, 128>}, {pipeline_mode = #tpu.pipeline_mode<synchronous>, transform_indices = @transform_9, window_bounds = array<i64: 1, 128>}, {pipeline_mode = #tpu.pipeline_mode<synchronous>, transform_indices = @transform_10, window_bounds = array<i64: 128, 128>}, {pipeline_mode = #tpu.pipeline_mode<synchronous>, transform_indices = @transform_11, window_bounds = array<i64: 1, 128>}, {pipeline_mode = #tpu.pipeline_mode<synchronous>, transform_indices = @transform_12, window_bounds = array<i64: 1, 128>}, {pipeline_mode = #tpu.pipeline_mode<synchronous>, transform_indices = @transform_13, window_bounds = array<i64: 1, 128>}, {pipeline_mode = #tpu.pipeline_mode<synchronous>, transform_indices = @transform_14, window_bounds = array<i64: 128, 256>}, {pipeline_mode = #tpu.pipeline_mode<synchronous>, transform_indices = @transform_15, window_bounds = array<i64: 1, 256>}, {pipeline_mode = #tpu.pipeline_mode<synchronous>, transform_indices = @transform_16, window_bounds = array<i64: 256, 128>}, {pipeline_mode = #tpu.pipeline_mode<synchronous>, transform_indices = @transform_17, window_bounds = array<i64: 1, 128>}, {transform_indices = @transform_18, window_bounds = array<i64: 2, 8, 128>}]} {
    %c0 = arith.constant 0 : index
    %c0_0 = arith.constant 0 : index
    %c0_1 = arith.constant 0 : index
    %0 = vector.load %arg1[%c0, %c0_0, %c0_1] : memref<2x8x128xf32, #tpu.memory_space<vmem>>, vector<2x8x128xf32>
    %1 = vector.shape_cast %0 : vector<2x8x128xf32> to vector<16x128xf32>
    %c0_2 = arith.constant 0 : index
    %c0_3 = arith.constant 0 : index
    %c0_4 = arith.constant 0 : index
    %2 = vector.load %arg2[%c0_2, %c0_3, %c0_4] : memref<2x16x128xf32, #tpu.memory_space<vmem>>, vector<2x16x128xf32>
    %3 = vector.shape_cast %2 : vector<2x16x128xf32> to vector<32x128xf32>
    %c0_5 = arith.constant 0 : index
    %c0_6 = arith.constant 0 : index
    %4 = vector.load %arg3[%c0_5, %c0_6] : memref<1x128xf32, #tpu.memory_space<vmem>>, vector<1x128xf32>
    %5 = vector.shape_cast %4 : vector<1x128xf32> to vector<128xf32>
    %c0_7 = arith.constant 0 : index
    %c0_8 = arith.constant 0 : index
    %6 = vector.load %arg4[%c0_7, %c0_8] : memref<1x128xf32, #tpu.memory_space<vmem>>, vector<1x128xf32>
    %7 = vector.shape_cast %6 : vector<1x128xf32> to vector<128xf32>
    %cst = arith.constant dense<0.000000e+00> : vector<16xf32>
    %8 = vector.multi_reduction <add>, %1, %cst [1] : vector<16x128xf32> to vector<16xf32>
    %9 = vector.shape_cast %8 : vector<16xf32> to vector<16x1xf32>
    %cst_9 = arith.constant 1.280000e+02 : f32
    %10 = vector.broadcast %cst_9 : f32 to vector<16x1xf32>
    %11 = arith.divf %9, %10 : vector<16x1xf32>
    %12 = vector.broadcast %11 : vector<16x1xf32> to vector<16x128xf32>
    %13 = arith.subf %1, %12 : vector<16x128xf32>
    %14 = arith.mulf %13, %13 : vector<16x128xf32>
    %cst_10 = arith.constant dense<0.000000e+00> : vector<16xf32>
    %15 = vector.multi_reduction <add>, %14, %cst_10 [1] : vector<16x128xf32> to vector<16xf32>
    %16 = vector.shape_cast %15 : vector<16xf32> to vector<16x1xf32>
    %cst_11 = arith.constant 1.280000e+02 : f32
    %17 = vector.broadcast %cst_11 : f32 to vector<16x1xf32>
    %18 = arith.divf %16, %17 : vector<16x1xf32>
    %19 = vector.broadcast %11 : vector<16x1xf32> to vector<16x128xf32>
    %20 = arith.subf %1, %19 : vector<16x128xf32>
    %cst_12 = arith.constant 9.99999974E-6 : f32
    %21 = vector.broadcast %cst_12 : f32 to vector<16x1xf32>
    %22 = arith.addf %18, %21 : vector<16x1xf32>
    %23 = math.rsqrt %22 : vector<16x1xf32>
    %24 = vector.broadcast %23 : vector<16x1xf32> to vector<16x128xf32>
    %25 = arith.mulf %20, %24 : vector<16x128xf32>
    %26 = vector.shape_cast %5 : vector<128xf32> to vector<1x128xf32>
    %27 = vector.broadcast %26 : vector<1x128xf32> to vector<16x128xf32>
    %28 = arith.mulf %25, %27 : vector<16x128xf32>
    %29 = vector.shape_cast %7 : vector<128xf32> to vector<1x128xf32>
    %30 = vector.broadcast %29 : vector<1x128xf32> to vector<16x128xf32>
    %31 = arith.addf %28, %30 : vector<16x128xf32>
    %cst_13 = arith.constant dense<0.000000e+00> : vector<32xf32>
    %32 = vector.multi_reduction <add>, %3, %cst_13 [1] : vector<32x128xf32> to vector<32xf32>
    %33 = vector.shape_cast %32 : vector<32xf32> to vector<32x1xf32>
    %cst_14 = arith.constant 1.280000e+02 : f32
    %34 = vector.broadcast %cst_14 : f32 to vector<32x1xf32>
    %35 = arith.divf %33, %34 : vector<32x1xf32>
    %36 = vector.broadcast %35 : vector<32x1xf32> to vector<32x128xf32>
    %37 = arith.subf %3, %36 : vector<32x128xf32>
    %38 = arith.mulf %37, %37 : vector<32x128xf32>
    %cst_15 = arith.constant dense<0.000000e+00> : vector<32xf32>
    %39 = vector.multi_reduction <add>, %38, %cst_15 [1] : vector<32x128xf32> to vector<32xf32>
    %40 = vector.shape_cast %39 : vector<32xf32> to vector<32x1xf32>
    %cst_16 = arith.constant 1.280000e+02 : f32
    %41 = vector.broadcast %cst_16 : f32 to vector<32x1xf32>
    %42 = arith.divf %40, %41 : vector<32x1xf32>
    %43 = vector.broadcast %35 : vector<32x1xf32> to vector<32x128xf32>
    %44 = arith.subf %3, %43 : vector<32x128xf32>
    %cst_17 = arith.constant 9.99999974E-6 : f32
    %45 = vector.broadcast %cst_17 : f32 to vector<32x1xf32>
    %46 = arith.addf %42, %45 : vector<32x1xf32>
    %47 = math.rsqrt %46 : vector<32x1xf32>
    %48 = vector.broadcast %47 : vector<32x1xf32> to vector<32x128xf32>
    %49 = arith.mulf %44, %48 : vector<32x128xf32>
    %50 = vector.shape_cast %5 : vector<128xf32> to vector<1x128xf32>
    %51 = vector.broadcast %50 : vector<1x128xf32> to vector<32x128xf32>
    %52 = arith.mulf %49, %51 : vector<32x128xf32>
    %53 = vector.shape_cast %7 : vector<128xf32> to vector<1x128xf32>
    %54 = vector.broadcast %53 : vector<1x128xf32> to vector<32x128xf32>
    %55 = arith.addf %52, %54 : vector<32x128xf32>
    %c0_18 = arith.constant 0 : index
    %c0_19 = arith.constant 0 : index
    %56 = vector.load %arg5[%c0_18, %c0_19] : memref<128x128xf32, #tpu.memory_space<vmem>>, vector<128x128xf32>
    %cst_20 = arith.constant dense<0.000000e+00> : vector<16x128xf32>
    %57 = tpu.matmul %31, %56, %cst_20 {dimension_numbers = #tpu.dot_dimension_numbers<[1], [0], [0], [1], [0, 0, 1, 1], [], []>} : vector<16x128xf32>, vector<128x128xf32>, vector<16x128xf32> -> vector<16x128xf32>
    %c0_21 = arith.constant 0 : index
    %c0_22 = arith.constant 0 : index
    %58 = vector.load %arg8[%c0_21, %c0_22] : memref<1x128xf32, #tpu.memory_space<vmem>>, vector<1x128xf32>
    %59 = vector.shape_cast %58 : vector<1x128xf32> to vector<128xf32>
    %60 = vector.shape_cast %59 : vector<128xf32> to vector<1x128xf32>
    %61 = vector.broadcast %60 : vector<1x128xf32> to vector<16x128xf32>
    %62 = arith.addf %57, %61 : vector<16x128xf32>
    %cst_23 = arith.constant 0.176776692 : f32
    %63 = vector.broadcast %cst_23 : f32 to vector<16x128xf32>
    %64 = arith.mulf %62, %63 : vector<16x128xf32>
    %c0_24 = arith.constant 0 : index
    %c0_25 = arith.constant 0 : index
    %65 = vector.load %arg6[%c0_24, %c0_25] : memref<128x128xf32, #tpu.memory_space<vmem>>, vector<128x128xf32>
    %cst_26 = arith.constant dense<0.000000e+00> : vector<32x128xf32>
    %66 = tpu.matmul %55, %65, %cst_26 {dimension_numbers = #tpu.dot_dimension_numbers<[1], [0], [0], [1], [0, 0, 1, 1], [], []>} : vector<32x128xf32>, vector<128x128xf32>, vector<32x128xf32> -> vector<32x128xf32>
    %c0_27 = arith.constant 0 : index
    %c0_28 = arith.constant 0 : index
    %67 = vector.load %arg9[%c0_27, %c0_28] : memref<1x128xf32, #tpu.memory_space<vmem>>, vector<1x128xf32>
    %68 = vector.shape_cast %67 : vector<1x128xf32> to vector<128xf32>
    %69 = vector.shape_cast %68 : vector<128xf32> to vector<1x128xf32>
    %70 = vector.broadcast %69 : vector<1x128xf32> to vector<32x128xf32>
    %71 = arith.addf %66, %70 : vector<32x128xf32>
    %c0_29 = arith.constant 0 : index
    %c0_30 = arith.constant 0 : index
    %72 = vector.load %arg7[%c0_29, %c0_30] : memref<128x128xf32, #tpu.memory_space<vmem>>, vector<128x128xf32>
    %cst_31 = arith.constant dense<0.000000e+00> : vector<32x128xf32>
    %73 = tpu.matmul %55, %72, %cst_31 {dimension_numbers = #tpu.dot_dimension_numbers<[1], [0], [0], [1], [0, 0, 1, 1], [], []>} : vector<32x128xf32>, vector<128x128xf32>, vector<32x128xf32> -> vector<32x128xf32>
    %c0_32 = arith.constant 0 : index
    %c0_33 = arith.constant 0 : index
    %74 = vector.load %arg10[%c0_32, %c0_33] : memref<1x128xf32, #tpu.memory_space<vmem>>, vector<1x128xf32>
    %75 = vector.shape_cast %74 : vector<1x128xf32> to vector<128xf32>
    %76 = vector.shape_cast %75 : vector<128xf32> to vector<1x128xf32>
    %77 = vector.broadcast %76 : vector<1x128xf32> to vector<32x128xf32>
    %78 = arith.addf %73, %77 : vector<32x128xf32>
    %79 = vector.shape_cast %64 : vector<16x128xf32> to vector<2x8x128xf32>
    %80 = vector.shape_cast %71 : vector<32x128xf32> to vector<2x16x128xf32>
    %81 = vector.shape_cast %78 : vector<32x128xf32> to vector<2x16x128xf32>
    %82 = vector.extract_strided_slice %79 {offsets = [0, 0, 0], sizes = [2, 8, 32], strides = [1, 1, 1]} : vector<2x8x128xf32> to vector<2x8x32xf32>
    %83 = vector.extract_strided_slice %80 {offsets = [0, 0, 0], sizes = [2, 16, 32], strides = [1, 1, 1]} : vector<2x16x128xf32> to vector<2x16x32xf32>
    %84 = vector.extract_strided_slice %81 {offsets = [0, 0, 0], sizes = [2, 16, 32], strides = [1, 1, 1]} : vector<2x16x128xf32> to vector<2x16x32xf32>
    "tpu.trace_start"() <{level = 10 : i32, message = "bqd,bkd->bqk"}> : () -> ()
    %cst_34 = arith.constant dense<0.000000e+00> : vector<2x8x16xf32>
    %85 = tpu.matmul %82, %83, %cst_34 {dimension_numbers = #tpu.dot_dimension_numbers<[2], [2], [1], [1], [0, 0, 0, 1, 1, 1], [0], [0]>} : vector<2x8x32xf32>, vector<2x16x32xf32>, vector<2x8x16xf32> -> vector<2x8x16xf32>
    "tpu.trace_stop"() : () -> ()
    %cst_35 = arith.constant dense<0xFF800000> : vector<2x8xf32>
    %86 = vector.multi_reduction <maximumf>, %85, %cst_35 [2] : vector<2x8x16xf32> to vector<2x8xf32>
    %87 = vector.shape_cast %86 : vector<2x8xf32> to vector<2x8x1xf32>
    %88 = vector.broadcast %87 : vector<2x8x1xf32> to vector<2x8x16xf32>
    %89 = arith.subf %85, %88 : vector<2x8x16xf32>
    %90 = math.exp %89 : vector<2x8x16xf32>
    %cst_36 = arith.constant dense<0.000000e+00> : vector<2x8xf32>
    %91 = vector.multi_reduction <add>, %90, %cst_36 [2] : vector<2x8x16xf32> to vector<2x8xf32>
    %92 = vector.shape_cast %91 : vector<2x8xf32> to vector<2x8x1xf32>
    "tpu.trace_start"() <{level = 10 : i32, message = "bqk,bkd->bqd"}> : () -> ()
    %cst_37 = arith.constant dense<0.000000e+00> : vector<2x8x32xf32>
    %93 = tpu.matmul %90, %84, %cst_37 {dimension_numbers = #tpu.dot_dimension_numbers<[2], [1], [1], [2], [0, 0, 0, 1, 1, 2], [0], [0]>} : vector<2x8x16xf32>, vector<2x16x32xf32>, vector<2x8x32xf32> -> vector<2x8x32xf32>
    "tpu.trace_stop"() : () -> ()
    %94 = vector.broadcast %92 : vector<2x8x1xf32> to vector<2x8x32xf32>
    %95 = arith.divf %93, %94 : vector<2x8x32xf32>
    %96 = vector.shape_cast %95 : vector<2x8x32xf32> to vector<16x32xf32>
    %c0_38 = arith.constant 0 : index
    %c0_39 = arith.constant 0 : index
    %97 = vector.load %arg20[%c0_38, %c0_39] : memref<16x128xf32, #tpu.memory_space<vmem>>, vector<16x32xf32>
    tpu.vector_store %arg20[%c0_38, %c0_39], %96 {strides = array<i32>} : memref<16x128xf32, #tpu.memory_space<vmem>>, vector<16x32xf32>,
    %98 = vector.extract_strided_slice %79 {offsets = [0, 0, 32], sizes = [2, 8, 32], strides = [1, 1, 1]} : vector<2x8x128xf32> to vector<2x8x32xf32>
    %99 = vector.extract_strided_slice %80 {offsets = [0, 0, 32], sizes = [2, 16, 32], strides = [1, 1, 1]} : vector<2x16x128xf32> to vector<2x16x32xf32>
    %100 = vector.extract_strided_slice %81 {offsets = [0, 0, 32], sizes = [2, 16, 32], strides = [1, 1, 1]} : vector<2x16x128xf32> to vector<2x16x32xf32>
    "tpu.trace_start"() <{level = 10 : i32, message = "bqd,bkd->bqk"}> : () -> ()
    %cst_40 = arith.constant dense<0.000000e+00> : vector<2x8x16xf32>
    %101 = tpu.matmul %98, %99, %cst_40 {dimension_numbers = #tpu.dot_dimension_numbers<[2], [2], [1], [1], [0, 0, 0, 1, 1, 1], [0], [0]>} : vector<2x8x32xf32>, vector<2x16x32xf32>, vector<2x8x16xf32> -> vector<2x8x16xf32>
    "tpu.trace_stop"() : () -> ()
    %cst_41 = arith.constant dense<0xFF800000> : vector<2x8xf32>
    %102 = vector.multi_reduction <maximumf>, %101, %cst_41 [2] : vector<2x8x16xf32> to vector<2x8xf32>
    %103 = vector.shape_cast %102 : vector<2x8xf32> to vector<2x8x1xf32>
    %104 = vector.broadcast %103 : vector<2x8x1xf32> to vector<2x8x16xf32>
    %105 = arith.subf %101, %104 : vector<2x8x16xf32>
    %106 = math.exp %105 : vector<2x8x16xf32>
    %cst_42 = arith.constant dense<0.000000e+00> : vector<2x8xf32>
    %107 = vector.multi_reduction <add>, %106, %cst_42 [2] : vector<2x8x16xf32> to vector<2x8xf32>
    %108 = vector.shape_cast %107 : vector<2x8xf32> to vector<2x8x1xf32>
    "tpu.trace_start"() <{level = 10 : i32, message = "bqk,bkd->bqd"}> : () -> ()
    %cst_43 = arith.constant dense<0.000000e+00> : vector<2x8x32xf32>
    %109 = tpu.matmul %106, %100, %cst_43 {dimension_numbers = #tpu.dot_dimension_numbers<[2], [1], [1], [2], [0, 0, 0, 1, 1, 2], [0], [0]>} : vector<2x8x16xf32>, vector<2x16x32xf32>, vector<2x8x32xf32> -> vector<2x8x32xf32>
    "tpu.trace_stop"() : () -> ()
    %110 = vector.broadcast %108 : vector<2x8x1xf32> to vector<2x8x32xf32>
    %111 = arith.divf %109, %110 : vector<2x8x32xf32>
    %112 = vector.shape_cast %111 : vector<2x8x32xf32> to vector<16x32xf32>
    %c0_44 = arith.constant 0 : index
    %c32 = arith.constant 32 : index
    %113 = vector.load %arg20[%c0_44, %c32] : memref<16x128xf32, #tpu.memory_space<vmem>>, vector<16x32xf32>
    tpu.vector_store %arg20[%c0_44, %c32], %112 {strides = array<i32>} : memref<16x128xf32, #tpu.memory_space<vmem>>, vector<16x32xf32>,
    %114 = vector.extract_strided_slice %79 {offsets = [0, 0, 64], sizes = [2, 8, 32], strides = [1, 1, 1]} : vector<2x8x128xf32> to vector<2x8x32xf32>
    %115 = vector.extract_strided_slice %80 {offsets = [0, 0, 64], sizes = [2, 16, 32], strides = [1, 1, 1]} : vector<2x16x128xf32> to vector<2x16x32xf32>
    %116 = vector.extract_strided_slice %81 {offsets = [0, 0, 64], sizes = [2, 16, 32], strides = [1, 1, 1]} : vector<2x16x128xf32> to vector<2x16x32xf32>
    "tpu.trace_start"() <{level = 10 : i32, message = "bqd,bkd->bqk"}> : () -> ()
    %cst_45 = arith.constant dense<0.000000e+00> : vector<2x8x16xf32>
    %117 = tpu.matmul %114, %115, %cst_45 {dimension_numbers = #tpu.dot_dimension_numbers<[2], [2], [1], [1], [0, 0, 0, 1, 1, 1], [0], [0]>} : vector<2x8x32xf32>, vector<2x16x32xf32>, vector<2x8x16xf32> -> vector<2x8x16xf32>
    "tpu.trace_stop"() : () -> ()
    %cst_46 = arith.constant dense<0xFF800000> : vector<2x8xf32>
    %118 = vector.multi_reduction <maximumf>, %117, %cst_46 [2] : vector<2x8x16xf32> to vector<2x8xf32>
    %119 = vector.shape_cast %118 : vector<2x8xf32> to vector<2x8x1xf32>
    %120 = vector.broadcast %119 : vector<2x8x1xf32> to vector<2x8x16xf32>
    %121 = arith.subf %117, %120 : vector<2x8x16xf32>
    %122 = math.exp %121 : vector<2x8x16xf32>
    %cst_47 = arith.constant dense<0.000000e+00> : vector<2x8xf32>
    %123 = vector.multi_reduction <add>, %122, %cst_47 [2] : vector<2x8x16xf32> to vector<2x8xf32>
    %124 = vector.shape_cast %123 : vector<2x8xf32> to vector<2x8x1xf32>
    "tpu.trace_start"() <{level = 10 : i32, message = "bqk,bkd->bqd"}> : () -> ()
    %cst_48 = arith.constant dense<0.000000e+00> : vector<2x8x32xf32>
    %125 = tpu.matmul %122, %116, %cst_48 {dimension_numbers = #tpu.dot_dimension_numbers<[2], [1], [1], [2], [0, 0, 0, 1, 1, 2], [0], [0]>} : vector<2x8x16xf32>, vector<2x16x32xf32>, vector<2x8x32xf32> -> vector<2x8x32xf32>
    "tpu.trace_stop"() : () -> ()
    %126 = vector.broadcast %124 : vector<2x8x1xf32> to vector<2x8x32xf32>
    %127 = arith.divf %125, %126 : vector<2x8x32xf32>
    %128 = vector.shape_cast %127 : vector<2x8x32xf32> to vector<16x32xf32>
    %c0_49 = arith.constant 0 : index
    %c64 = arith.constant 64 : index
    %129 = vector.load %arg20[%c0_49, %c64] : memref<16x128xf32, #tpu.memory_space<vmem>>, vector<16x32xf32>
    tpu.vector_store %arg20[%c0_49, %c64], %128 {strides = array<i32>} : memref<16x128xf32, #tpu.memory_space<vmem>>, vector<16x32xf32>,
    %130 = vector.extract_strided_slice %79 {offsets = [0, 0, 96], sizes = [2, 8, 32], strides = [1, 1, 1]} : vector<2x8x128xf32> to vector<2x8x32xf32>
    %131 = vector.extract_strided_slice %80 {offsets = [0, 0, 96], sizes = [2, 16, 32], strides = [1, 1, 1]} : vector<2x16x128xf32> to vector<2x16x32xf32>
    %132 = vector.extract_strided_slice %81 {offsets = [0, 0, 96], sizes = [2, 16, 32], strides = [1, 1, 1]} : vector<2x16x128xf32> to vector<2x16x32xf32>
    "tpu.trace_start"() <{level = 10 : i32, message = "bqd,bkd->bqk"}> : () -> ()
    %cst_50 = arith.constant dense<0.000000e+00> : vector<2x8x16xf32>
    %133 = tpu.matmul %130, %131, %cst_50 {dimension_numbers = #tpu.dot_dimension_numbers<[2], [2], [1], [1], [0, 0, 0, 1, 1, 1], [0], [0]>} : vector<2x8x32xf32>, vector<2x16x32xf32>, vector<2x8x16xf32> -> vector<2x8x16xf32>
    "tpu.trace_stop"() : () -> ()
    %cst_51 = arith.constant dense<0xFF800000> : vector<2x8xf32>
    %134 = vector.multi_reduction <maximumf>, %133, %cst_51 [2] : vector<2x8x16xf32> to vector<2x8xf32>
    %135 = vector.shape_cast %134 : vector<2x8xf32> to vector<2x8x1xf32>
    %136 = vector.broadcast %135 : vector<2x8x1xf32> to vector<2x8x16xf32>
    %137 = arith.subf %133, %136 : vector<2x8x16xf32>
    %138 = math.exp %137 : vector<2x8x16xf32>
    %cst_52 = arith.constant dense<0.000000e+00> : vector<2x8xf32>
    %139 = vector.multi_reduction <add>, %138, %cst_52 [2] : vector<2x8x16xf32> to vector<2x8xf32>
    %140 = vector.shape_cast %139 : vector<2x8xf32> to vector<2x8x1xf32>
    "tpu.trace_start"() <{level = 10 : i32, message = "bqk,bkd->bqd"}> : () -> ()
    %cst_53 = arith.constant dense<0.000000e+00> : vector<2x8x32xf32>
    %141 = tpu.matmul %138, %132, %cst_53 {dimension_numbers = #tpu.dot_dimension_numbers<[2], [1], [1], [2], [0, 0, 0, 1, 1, 2], [0], [0]>} : vector<2x8x16xf32>, vector<2x16x32xf32>, vector<2x8x32xf32> -> vector<2x8x32xf32>
    "tpu.trace_stop"() : () -> ()
    %142 = vector.broadcast %140 : vector<2x8x1xf32> to vector<2x8x32xf32>
    %143 = arith.divf %141, %142 : vector<2x8x32xf32>
    %144 = vector.shape_cast %143 : vector<2x8x32xf32> to vector<16x32xf32>
    %c0_54 = arith.constant 0 : index
    %c96 = arith.constant 96 : index
    %145 = vector.load %arg20[%c0_54, %c96] : memref<16x128xf32, #tpu.memory_space<vmem>>, vector<16x32xf32>
    tpu.vector_store %arg20[%c0_54, %c96], %144 {strides = array<i32>} : memref<16x128xf32, #tpu.memory_space<vmem>>, vector<16x32xf32>,
    %c0_55 = arith.constant 0 : index
    %c0_56 = arith.constant 0 : index
    %146 = vector.load %arg20[%c0_55, %c0_56] : memref<16x128xf32, #tpu.memory_space<vmem>>, vector<16x128xf32>
    %c0_57 = arith.constant 0 : index
    %c0_58 = arith.constant 0 : index
    %147 = vector.load %arg11[%c0_57, %c0_58] : memref<128x128xf32, #tpu.memory_space<vmem>>, vector<128x128xf32>
    %cst_59 = arith.constant dense<0.000000e+00> : vector<16x128xf32>
    %148 = tpu.matmul %146, %147, %cst_59 {dimension_numbers = #tpu.dot_dimension_numbers<[1], [0], [0], [1], [0, 0, 1, 1], [], []>} : vector<16x128xf32>, vector<128x128xf32>, vector<16x128xf32> -> vector<16x128xf32>
    %c0_60 = arith.constant 0 : index
    %c0_61 = arith.constant 0 : index
    %149 = vector.load %arg12[%c0_60, %c0_61] : memref<1x128xf32, #tpu.memory_space<vmem>>, vector<1x128xf32>
    %150 = vector.shape_cast %149 : vector<1x128xf32> to vector<128xf32>
    %151 = vector.shape_cast %150 : vector<128xf32> to vector<1x128xf32>
    %152 = vector.broadcast %151 : vector<1x128xf32> to vector<16x128xf32>
    %153 = arith.addf %148, %152 : vector<16x128xf32>
    %154 = arith.addf %1, %153 : vector<16x128xf32>
    %c0_62 = arith.constant 0 : index
    %c0_63 = arith.constant 0 : index
    %155 = vector.load %arg13[%c0_62, %c0_63] : memref<1x128xf32, #tpu.memory_space<vmem>>, vector<1x128xf32>
    %156 = vector.shape_cast %155 : vector<1x128xf32> to vector<128xf32>
    %c0_64 = arith.constant 0 : index
    %c0_65 = arith.constant 0 : index
    %157 = vector.load %arg14[%c0_64, %c0_65] : memref<1x128xf32, #tpu.memory_space<vmem>>, vector<1x128xf32>
    %158 = vector.shape_cast %157 : vector<1x128xf32> to vector<128xf32>
    %cst_66 = arith.constant dense<0.000000e+00> : vector<16xf32>
    %159 = vector.multi_reduction <add>, %154, %cst_66 [1] : vector<16x128xf32> to vector<16xf32>
    %160 = vector.shape_cast %159 : vector<16xf32> to vector<16x1xf32>
    %cst_67 = arith.constant 1.280000e+02 : f32
    %161 = vector.broadcast %cst_67 : f32 to vector<16x1xf32>
    %162 = arith.divf %160, %161 : vector<16x1xf32>
    %163 = vector.broadcast %162 : vector<16x1xf32> to vector<16x128xf32>
    %164 = arith.subf %154, %163 : vector<16x128xf32>
    %165 = arith.mulf %164, %164 : vector<16x128xf32>
    %cst_68 = arith.constant dense<0.000000e+00> : vector<16xf32>
    %166 = vector.multi_reduction <add>, %165, %cst_68 [1] : vector<16x128xf32> to vector<16xf32>
    %167 = vector.shape_cast %166 : vector<16xf32> to vector<16x1xf32>
    %cst_69 = arith.constant 1.280000e+02 : f32
    %168 = vector.broadcast %cst_69 : f32 to vector<16x1xf32>
    %169 = arith.divf %167, %168 : vector<16x1xf32>
    %170 = vector.broadcast %162 : vector<16x1xf32> to vector<16x128xf32>
    %171 = arith.subf %154, %170 : vector<16x128xf32>
    %cst_70 = arith.constant 9.99999974E-6 : f32
    %172 = vector.broadcast %cst_70 : f32 to vector<16x1xf32>
    %173 = arith.addf %169, %172 : vector<16x1xf32>
    %174 = math.rsqrt %173 : vector<16x1xf32>
    %175 = vector.broadcast %174 : vector<16x1xf32> to vector<16x128xf32>
    %176 = arith.mulf %171, %175 : vector<16x128xf32>
    %177 = vector.shape_cast %156 : vector<128xf32> to vector<1x128xf32>
    %178 = vector.broadcast %177 : vector<1x128xf32> to vector<16x128xf32>
    %179 = arith.mulf %176, %178 : vector<16x128xf32>
    %180 = vector.shape_cast %158 : vector<128xf32> to vector<1x128xf32>
    %181 = vector.broadcast %180 : vector<1x128xf32> to vector<16x128xf32>
    %182 = arith.addf %179, %181 : vector<16x128xf32>
    %c0_71 = arith.constant 0 : index
    %c0_72 = arith.constant 0 : index
    %183 = vector.load %arg15[%c0_71, %c0_72] : memref<128x256xf32, #tpu.memory_space<vmem>>, vector<128x256xf32>
    %cst_73 = arith.constant dense<0.000000e+00> : vector<16x256xf32>
    %184 = tpu.matmul %182, %183, %cst_73 {dimension_numbers = #tpu.dot_dimension_numbers<[1], [0], [0], [1], [0, 0, 1, 1], [], []>} : vector<16x128xf32>, vector<128x256xf32>, vector<16x256xf32> -> vector<16x256xf32>
    %c0_74 = arith.constant 0 : index
    %c0_75 = arith.constant 0 : index
    %185 = vector.load %arg16[%c0_74, %c0_75] : memref<1x256xf32, #tpu.memory_space<vmem>>, vector<1x256xf32>
    %186 = vector.shape_cast %185 : vector<1x256xf32> to vector<256xf32>
    %187 = vector.shape_cast %186 : vector<256xf32> to vector<1x256xf32>
    %188 = vector.broadcast %187 : vector<1x256xf32> to vector<16x256xf32>
    %189 = arith.addf %184, %188 : vector<16x256xf32>
    %cst_76 = arith.constant 5.000000e-01 : f32
    %190 = vector.broadcast %cst_76 : f32 to vector<16x256xf32>
    %191 = arith.mulf %190, %189 : vector<16x256xf32>
    %cst_77 = arith.constant 0.707106769 : f32
    %192 = vector.broadcast %cst_77 : f32 to vector<16x256xf32>
    %193 = arith.mulf %189, %192 : vector<16x256xf32>
    %194 = math.erf %193 : vector<16x256xf32>
    %cst_78 = arith.constant 1.000000e+00 : f32
    %195 = vector.broadcast %cst_78 : f32 to vector<16x256xf32>
    %196 = arith.addf %195, %194 : vector<16x256xf32>
    %197 = arith.mulf %191, %196 : vector<16x256xf32>
    %c0_79 = arith.constant 0 : index
    %c0_80 = arith.constant 0 : index
    %198 = vector.load %arg17[%c0_79, %c0_80] : memref<256x128xf32, #tpu.memory_space<vmem>>, vector<256x128xf32>
    %cst_81 = arith.constant dense<0.000000e+00> : vector<16x128xf32>
    %199 = tpu.matmul %197, %198, %cst_81 {dimension_numbers = #tpu.dot_dimension_numbers<[1], [0], [0], [1], [0, 0, 1, 1], [], []>} : vector<16x256xf32>, vector<256x128xf32>, vector<16x128xf32> -> vector<16x128xf32>
    %c0_82 = arith.constant 0 : index
    %c0_83 = arith.constant 0 : index
    %200 = vector.load %arg18[%c0_82, %c0_83] : memref<1x128xf32, #tpu.memory_space<vmem>>, vector<1x128xf32>
    %201 = vector.shape_cast %200 : vector<1x128xf32> to vector<128xf32>
    %202 = vector.shape_cast %201 : vector<128xf32> to vector<1x128xf32>
    %203 = vector.broadcast %202 : vector<1x128xf32> to vector<16x128xf32>
    %204 = arith.addf %199, %203 : vector<16x128xf32>
    %205 = arith.addf %154, %204 : vector<16x128xf32>
    %206 = vector.shape_cast %205 : vector<16x128xf32> to vector<2x8x128xf32>
    %c0_84 = arith.constant 0 : index
    %c0_85 = arith.constant 0 : index
    %c0_86 = arith.constant 0 : index
    %207 = vector.load %arg19[%c0_84, %c0_85, %c0_86] : memref<2x8x128xf32, #tpu.memory_space<vmem>>, vector<2x8x128xf32>
    tpu.vector_store %arg19[%c0_84, %c0_85, %c0_86], %206 {strides = array<i32>} : memref<2x8x128xf32, #tpu.memory_space<vmem>>, vector<2x8x128xf32>,
    return
  }
  func.func @transform_0(%arg0: i32) -> (i32, i32, i32) {
    %c0_i32 = arith.constant 0 : i32
    %c0_i32_0 = arith.constant 0 : i32
    %c0_i32_1 = arith.constant 0 : i32
    return %arg0, %c0_i32, %c0_i32_0 : i32, i32, i32
  }
  func.func @transform_1(%arg0: i32) -> (i32, i32, i32) {
    %c0_i32 = arith.constant 0 : i32
    %c0_i32_0 = arith.constant 0 : i32
    %c0_i32_1 = arith.constant 0 : i32
    return %arg0, %c0_i32, %c0_i32_0 : i32, i32, i32
  }
  func.func @transform_2(%arg0: i32) -> (i32, i32) {
    %c0_i32 = arith.constant 0 : i32
    %c0_i32_0 = arith.constant 0 : i32
    %c0_i32_1 = arith.constant 0 : i32
    return %c0_i32, %c0_i32_0 : i32, i32
  }
  func.func @transform_3(%arg0: i32) -> (i32, i32) {
    %c0_i32 = arith.constant 0 : i32
    %c0_i32_0 = arith.constant 0 : i32
    %c0_i32_1 = arith.constant 0 : i32
    return %c0_i32, %c0_i32_0 : i32, i32
  }
  func.func @transform_4(%arg0: i32) -> (i32, i32) {
    %c0_i32 = arith.constant 0 : i32
    %c0_i32_0 = arith.constant 0 : i32
    %c0_i32_1 = arith.constant 0 : i32
    return %c0_i32, %c0_i32_0 : i32, i32
  }
  func.func @transform_5(%arg0: i32) -> (i32, i32) {
    %c0_i32 = arith.constant 0 : i32
    %c0_i32_0 = arith.constant 0 : i32
    %c0_i32_1 = arith.constant 0 : i32
    return %c0_i32, %c0_i32_0 : i32, i32
  }
  func.func @transform_6(%arg0: i32) -> (i32, i32) {
    %c0_i32 = arith.constant 0 : i32
    %c0_i32_0 = arith.constant 0 : i32
    %c0_i32_1 = arith.constant 0 : i32
    return %c0_i32, %c0_i32_0 : i32, i32
  }
  func.func @transform_7(%arg0: i32) -> (i32, i32) {
    %c0_i32 = arith.constant 0 : i32
    %c0_i32_0 = arith.constant 0 : i32
    %c0_i32_1 = arith.constant 0 : i32
    return %c0_i32, %c0_i32_0 : i32, i32
  }
  func.func @transform_8(%arg0: i32) -> (i32, i32) {
    %c0_i32 = arith.constant 0 : i32
    %c0_i32_0 = arith.constant 0 : i32
    %c0_i32_1 = arith.constant 0 : i32
    return %c0_i32, %c0_i32_0 : i32, i32
  }
  func.func @transform_9(%arg0: i32) -> (i32, i32) {
    %c0_i32 = arith.constant 0 : i32
    %c0_i32_0 = arith.constant 0 : i32
    %c0_i32_1 = arith.constant 0 : i32
    return %c0_i32, %c0_i32_0 : i32, i32
  }
  func.func @transform_10(%arg0: i32) -> (i32, i32) {
    %c0_i32 = arith.constant 0 : i32
    %c0_i32_0 = arith.constant 0 : i32
    %c0_i32_1 = arith.constant 0 : i32
    return %c0_i32, %c0_i32_0 : i32, i32
  }
  func.func @transform_11(%arg0: i32) -> (i32, i32) {
    %c0_i32 = arith.constant 0 : i32
    %c0_i32_0 = arith.constant 0 : i32
    %c0_i32_1 = arith.constant 0 : i32
    return %c0_i32, %c0_i32_0 : i32, i32
  }
  func.func @transform_12(%arg0: i32) -> (i32, i32) {
    %c0_i32 = arith.constant 0 : i32
    %c0_i32_0 = arith.constant 0 : i32
    %c0_i32_1 = arith.constant 0 : i32
    return %c0_i32, %c0_i32_0 : i32, i32
  }
  func.func @transform_13(%arg0: i32) -> (i32, i32) {
    %c0_i32 = arith.constant 0 : i32
    %c0_i32_0 = arith.constant 0 : i32
    %c0_i32_1 = arith.constant 0 : i32
    return %c0_i32, %c0_i32_0 : i32, i32
  }
  func.func @transform_14(%arg0: i32) -> (i32, i32) {
    %c0_i32 = arith.constant 0 : i32
    %c0_i32_0 = arith.constant 0 : i32
    %c0_i32_1 = arith.constant 0 : i32
    return %c0_i32, %c0_i32_0 : i32, i32
  }
  func.func @transform_15(%arg0: i32) -> (i32, i32) {
    %c0_i32 = arith.constant 0 : i32
    %c0_i32_0 = arith.constant 0 : i32
    %c0_i32_1 = arith.constant 0 : i32
    return %c0_i32, %c0_i32_0 : i32, i32
  }
  func.func @transform_16(%arg0: i32) -> (i32, i32) {
    %c0_i32 = arith.constant 0 : i32
    %c0_i32_0 = arith.constant 0 : i32
    %c0_i32_1 = arith.constant 0 : i32
    return %c0_i32, %c0_i32_0 : i32, i32
  }
  func.func @transform_17(%arg0: i32) -> (i32, i32) {
    %c0_i32 = arith.constant 0 : i32
    %c0_i32_0 = arith.constant 0 : i32
    %c0_i32_1 = arith.constant 0 : i32
    return %c0_i32, %c0_i32_0 : i32, i32
  }
  func.func @transform_18(%arg0: i32) -> (i32, i32, i32) {
    %c0_i32 = arith.constant 0 : i32
    %c0_i32_0 = arith.constant 0 : i32
    %c0_i32_1 = arith.constant 0 : i32
    return %arg0, %c0_i32, %c0_i32_0 : i32, i32, i32
  }
}

</mosaic_0001>

<bundles_post_ra>
// kernel: tpu_custom_call.1
= control target key start
LH: loop header
LB: loop body
LE: loop exit
PB: predicated region body
PF: predicated region fallthrough
CT: control target
= control target key end

     0   :  { %s3785_s0 = inlined_call_operand.hbm [shape: f32[4,8,128], index: 0, kind: input, shape index: {}]   ;;  %s3786_s1 = inlined_call_operand.hbm [shape: f32[4,16,128], index: 1, kind: input, shape index: {}]   ;;  %s3787_s2 = inlined_call_operand.vmem [shape: f32[1,128], index: 2, kind: input, shape index: {}]   ;;  %s3788_s3 = inlined_call_operand.hbm [shape: f32[1,128], index: 3, kind: input, shape index: {}]   ;;  %s3789_s4 = inlined_call_operand.hbm [shape: f32[128,128], index: 4, kind: input, shape index: {}]   ;;  %s3790_s5 = inlined_call_operand.hbm [shape: f32[128,128], index: 5, kind: input, shape index: {}]   ;;  %s3791_s6 = inlined_call_operand.hbm [shape: f32[128,128], index: 6, kind: input, shape index: {}]   ;;  %s3792_s7 = inlined_call_operand.vmem [shape: f32[1,128], index: 7, kind: input, shape index: {}]   ;;  %s3793_s8 = inlined_call_operand.vmem [shape: f32[1,128], index: 8, kind: input, shape index: {}]   ;;  %s3794_s9 = inlined_call_operand.vmem [shape: f32[1,128], index: 9, kind: input, shape index: {}]   ;;  %s3795_s10 = inlined_call_operand.hbm [shape: f32[128,128], index: 10, kind: input, shape index: {}]   ;;  %s3796_s11 = inlined_call_operand.vmem [shape: f32[1,128], index: 11, kind: input, shape index: {}]   ;;  %s3797_s12 = inlined_call_operand.vmem [shape: f32[1,128], index: 12, kind: input, shape index: {}]   ;;  %s3798_s13 = inlined_call_operand.vmem [shape: f32[1,128], index: 13, kind: input, shape index: {}]   ;;  %s3799_s14 = inlined_call_operand.hbm [shape: f32[128,256], index: 14, kind: input, shape index: {}]   ;;  %s3800_s15 = inlined_call_operand.vmem [shape: f32[1,256], index: 15, kind: input, shape index: {}]   ;;  %s3801_s16 = inlined_call_operand.hbm [shape: f32[256,128], index: 16, kind: input, shape index: {}]   ;;  %s3802_s17 = inlined_call_operand.vmem [shape: f32[1,128], index: 17, kind: input, shape index: {}]   ;;  %s3803_s18 = inlined_call_operand.hbm [shape: f32[4,8,128], index: 18, kind: output, shape index: {}]  }
   0x1   :  { %3818 = sst [smem:[#allocation32_spill]] %s3785_s0 }
   0x2   :  { %3819 = sst [smem:[#allocation33_spill]] %s3786_s1 }
   0x3   :  { %3820 = sst [smem:[#allocation34_spill]] %s3787_s2 }
   0x4   :  { %3821 = sst [smem:[#allocation35_spill]] %s3788_s3 }
   0x5   :  { %3822 = sst [smem:[#allocation36_spill]] %s3789_s4 }
   0x6   :  { %3823 = sst [smem:[#allocation37_spill]] %s3790_s5 }
   0x7   :  { %3824 = sst [smem:[#allocation38_spill]] %s3791_s6 }
   0x8   :  { %3825 = sst [smem:[#allocation39_spill]] %s3795_s10 }
   0x9   :  { %3826 = sst [smem:[#allocation40_spill]] %s3799_s14 }
   0xa   :  { %3827 = sst [smem:[#allocation41_spill]] %s3800_s15 }
   0xb   :  { %3828 = sst [smem:[#allocation42_spill]] %s3801_s16 }
   0xc   :  { %3829 = sst [smem:[#allocation43_spill]] %s3802_s17 }
   0xd   :  { %3830 = sst [smem:[#allocation44_spill]] %s3803_s18 }
   0xe   :  { %23 = vsyncpa [#allocation4], 0 }
   0xf   :  { %25 = vsyncpa [#allocation4 + $0x1], 0 }
  0x10   :  { %26 = vsyncpa [#allocation7], 0 }
  0x11   :  { %28 = vsyncpa [#allocation7 + $0x1], 0 }
  0x12   :  { %29 = vsyncpa [#allocation10], 0 }
  0x13   :  { %30 = vsyncpa [#allocation13], 0 }
  0x14   :  { %31 = vsyncpa [#allocation16], 0 }
  0x15   :  { %32 = vsyncpa [#allocation5], 0 }
  0x16   :  { %34 = vsyncpa [#allocation5 + $0x1], 0  ;;  %s3151_s27 = smov 0   ;;  %s3153_s28 = smov 0  }
  0x17   :  { %s3155_s29 = smov 0   ;;  %s3157_s30 = smov 0  }
  0x18 LB: > { %3831 = sst [smem:[#allocation26_spill]] %s3025_s27  ;;  %s3175_s20 = sadd.s32 4294967295, %s3037_s30   ;;  %s3037_s30 = sphi %s3157_s30, %s3865_s30   ;;  %s3033_s29 = sphi %s3155_s29, %s3867_s29   ;;  %s3029_s28 = sphi %s3153_s28, %s3869_s28   ;;  %s3025_s27 = sphi %s3151_s27, %s3868_s27  }
  0x19   : > { %3832 = sst [smem:[#allocation27_spill]] %s3033_s29  ;;  %p2378_p0 = scmp.ge.s32.totalorder %s3037_s30, 1 }
  0x1a   : > { %s3833_s3 = sld [smem:[#allocation35_spill]]  ;;  %p61_p1 = scmp.eq.s32.totalorder %s3175_s20, 0 }
  0x1b   : > { %p459_p2 = scmp.lt.s32.totalorder %s3037_s30, 3  ;;  %s3039_s22 = smov [#allocation8]  }
  0x1c   : > { %s476_s2 = sshll.u32 %s3039_s22, 4  ;;  %s3835_s4 = sld [smem:[#allocation36_spill]]  ;;  %s477_s2 = int_to_ptr.vmem [resolvable:$true] %s476_s2 }
  0x1d   : > { %p3180_p3 = pnand %p2378_p0, %p459_p2  ;;  %s3040_s0 = smov [#allocation9]  }
  0x1e   : > { %s487_s19 = sshll.u32 %s3040_s0, 4  ;;  %s3807_s22 = smov 128   ;;  %s488_s19 = int_to_ptr.vmem [resolvable:$true] %s487_s19 }
  0x1f   : > { %p2484_p5 = pneg %p3180_p3  ;;  %s3837_s6 = sld [smem:[#allocation38_spill]] }
  0x20   : > { %s474_s1 = sshll.u32 %s3833_s3, 4  ;;  %s3809_s3 = smov 8   ;;  %s475_s1 = int_to_ptr.hbm [resolvable:$true] %s474_s1 }
  0x21   : > { %p3192_p6 = pnand %p2484_p5, %p61_p1  ;;  %s3043_s18 = smov [#allocation12]  }
  0x22   : > { %s485_s25 = sshll.u32 %s3835_s4, 4  ;;  %s515_s17 = sshll.u32 %s3043_s18, 4  ;;  %s486_s25 = int_to_ptr.hbm [resolvable:$true] %s485_s25  ;;  %s516_s17 = int_to_ptr.vmem [resolvable:$true] %s515_s17 }
  0x23   : > { %2487 = dma.hbm_to_vmem [thread:$0]  (!%p3192_p6), %s475_s1, 16, %s477_s2, [#allocation7]  }
  0x24   : > { %2490 = dma.hbm_to_vmem [thread:$0]  (!%p3192_p6), %s486_s25, 2048, %s488_s19, [#allocation10], %s3807_s22, %s3807_s22, %s3809_s3  }
  0x25   : > { %s513_s4 = sshll.u32 %s3837_s6, 4  ;;  %s3838_s14 = sld [smem:[#allocation40_spill]]  ;;  %s514_s4 = int_to_ptr.hbm [resolvable:$true] %s513_s4 }
  0x26   : > { %2496 = dma.hbm_to_vmem [thread:$0]  (!%p3192_p6), %s514_s4, 2048, %s516_s17, [#allocation13], %s3807_s22, %s3807_s22, %s3809_s3  }
  0x27   : > { %s3044_s2 = smov [#allocation15]   ;;  %s3045_s19 = smov 256  }
  0x28   : > { %s561_s25 = sshll.u32 %s3044_s2, 4  ;;  %s3046_s23 = smov 16   ;;  %s562_s25 = int_to_ptr.vmem [resolvable:$true] %s561_s25 }
  0x29   : > { %s3839_s5 = sld [smem:[#allocation37_spill]]  ;;  %s3047_s0 = smov [#allocation11]  }
  0x2a   : > { %s501_s6 = sshll.u32 %s3047_s0, 4  ;;  %s3840_s10 = sld [smem:[#allocation39_spill]]  ;;  %s502_s6 = int_to_ptr.vmem [resolvable:$true] %s501_s6 }
  0x2b   : > { %s559_s1 = sshll.u32 %s3838_s14, 4  ;;  %s3841_s16 = sld [smem:[#allocation42_spill]]  ;;  %s560_s1 = int_to_ptr.hbm [resolvable:$true] %s559_s1 }
  0x2c   : > { %2502 = dma.hbm_to_vmem [thread:$0]  (!%p3192_p6), %s560_s1, 4096, %s562_s25, [#allocation16], %s3045_s19, %s3045_s19, %s3046_s23  }
  0x2d   : > { %s3048_s1 = smov [#allocation14]   ;;  %s3242_s0 = sadd.s32 1, %s3037_s30  }
  0x2e   : > { %s538_s25 = sshll.u32 %s3048_s1, 4  ;;  %3842 = sst [smem:[#allocation28_spill]] %s3242_s0  ;;  %s539_s25 = int_to_ptr.vmem [resolvable:$true] %s538_s25 }
  0x2f   : > { %s499_s15 = sshll.u32 %s3839_s5, 4  ;;  %s47_s4 = sadd.s32 1, %s3033_s29  ;;  %s500_s15 = int_to_ptr.hbm [resolvable:$true] %s499_s15 }
  0x30   : > { %s536_s2 = sshll.u32 %s3840_s10, 4  ;;  %s44_s17 = ssub.s32 %s3037_s30, %s3242_s0  ;;  %s537_s2 = int_to_ptr.hbm [resolvable:$true] %s536_s2 }
  0x31   : > { %2493 = dma.hbm_to_vmem [thread:$0]  (!%p3192_p6), %s500_s15, 2048, %s502_s6, [#allocation10], %s3807_s22, %s3807_s22, %s3809_s3  }
  0x32   : > { %s576_s18 = sshll.u32 %s3841_s16, 4  ;;  %s3049_s6 = smov [#allocation17]   ;;  %s577_s18 = int_to_ptr.hbm [resolvable:$true] %s576_s18 }
  0x33   : > { %2499 = dma.hbm_to_vmem [thread:$0]  (!%p3192_p6), %s537_s2, 2048, %s539_s25, [#allocation13], %s3807_s22, %s3807_s22, %s3809_s3  }
  0x34   : > { %s578_s24 = sshll.u32 %s3049_s6, 4  ;;  %s2377_s15 = sadd.s32 4294967294, %s3037_s30   ;;  %s579_s24 = int_to_ptr.vmem [resolvable:$true] %s578_s24 }
  0x35   : > { %2505 = dma.hbm_to_vmem [thread:$0]  (!%p3192_p6), %s577_s18, 4096, %s579_s24, [#allocation16], %s3807_s22, %s3807_s22, %s3809_s3  }
  0x36   : > { %p54_p7 = scmp.ne.s32.totalorder %s3033_s29, %s3029_s28  ;;  %p45_p8 = scmp.eq.s32.totalorder %s44_s17, 0 }
  0x37   : > { %p55_p9 = scmp.eq.s32.totalorder %s3037_s30, 0  ;;  %p60_p10 = scmp.ne.s32.totalorder %s3029_s28, %s3025_s27 }
  0x38   : > { %p446_p11 = scmp.eq.s32.totalorder %s3175_s20, 1  ;;  %p452_p2 = scmp.eq.s32.totalorder %s2377_s15, 1 }
  0x39   : > { %s3254_s2 = scalar_select %p45_p8, %s3033_s29, %s47_s4  }
  0x3a   : > { %p3256_p12 = por %p55_p9, %p54_p7  ;;  %p3262_p13 = por %p61_p1, %p60_p10 }
  0x3b   : > { %3843 = sst [smem:[#allocation29_spill]] %s3254_s2  ;;  %p3266_p0 = por %p446_p11, %p54_p7 }
  0x3c   : > { %p2524_p5 = scmp.lt.s32.totalorder %s3037_s30, 2  ;;  %s3272_s19 = sand.u32 1, %s3033_s29  }
  0x3d   : > { %s3846_s25 = scalar_select %p3266_p0, 1, 0 }
  0x3e   : > { %p3274_p6 = por %p452_p2, %p60_p10  ;;  %s2387_s18 = sshll.u32 %s3272_s19, 4 }
  0x3f   : > { %3847 = sst [smem:[#allocation30_spill]] %s3846_s25  ;;  %s2446_s6 = sshll.u32 %s3037_s30, 4 }
  0x40   : > { %s3848_s23 = scalar_select %p3274_p6, 1, 0 }
  0x41   : > { %s3850_s17 = sld [smem:[#allocation32_spill]]  ;;  %s599_s5 = scalar_lea.vmem [#allocation3], %s2387_s18 }
  0x42   : > { %3849 = sst [smem:[#allocation31_spill]] %s3848_s23  ;;  %s607_s10 = sshll.u32 %s599_s5, 4  ;;  %s608_s10 = int_to_ptr.vmem [resolvable:$true] %s607_s10 }
  0x43   : > { %p3285_p7 = pnand %p2524_p5, %p3256_p12  ;;  %s617_s14 = sand.u32 1, %s3037_s30  }
  0x44   : > { %s2390_s16 = sshll.u32 %s3272_s19, 5  ;;  %s596_s2 = scalar_lea.sflag [#allocation4], %s3272_s19 }
  0x45   : > { %p2895_p9 = pneg %p3285_p7 }
  0x47   : > { %s604_s22 = scalar_lea.hbm %s3850_s17, %s2446_s6  ;;  %s2898_s26 = scalar_lea.hbm %s3850_s17, 32 }
  0x48   : > { %s605_s3 = sshll.u32 %s604_s22, 4  ;;  %s606_s3 = int_to_ptr.hbm [resolvable:$true] %s605_s3 }
  0x49   : > { %s2891_s29 = sshra.s32 %s606_s3, 4  ;;  %s2892_s29 = int_to_ptr.hbm [resolvable:$true] %s2891_s29 }
  0x4a   : > { %s2893_s0 = scalar_lea.hbm %s2892_s29, 16  ;;  %p2899_p12 = scmp.lt.s32.totalorder %s2892_s29, %s3850_s17 }
  0x4b   : > { %p2894_p8 = scmp.ne.s32.totalorder %s2892_s29, %s2893_s0  ;;  %p2900_p2 = scmp.lt.s32.totalorder %s2898_s26, %s2893_s0 }
  0x4d   : > { %p2896_p10 = pnand %p2895_p9, %p2894_p8  ;;  %p2901_p5 = por %p2900_p2, %p2899_p12 }
  0x4f   : > { %p2897_p11 = pneg %p2896_p10 }
  0x51   : > { %p2902_p4 = pnand %p2901_p5, %p2897_p11 }
  0x53   : > { %2905 = shalt.err (!%p2902_p4)
}
  0x54   : > { %s3852_s19 = smov 8   ;;  %s3853_s24 = smov 128  }
  0x55   : > { %2509 = dma.hbm_to_vmem [thread:$0]  (!%p3285_p7), %s606_s3, 256, %s608_s10, %s596_s2, %s3853_s24, %s3853_s24, %s3852_s19  }
  0x56   : > { %s2448_s4 = sshll.u32 %s3037_s30, 5  ;;  %s621_s23 = scalar_lea.vmem [#allocation6], %s2390_s16 }
  0x57   : > { %s630_s5 = sshll.u32 %s621_s23, 4  ;;  %s3854_s25 = sld [smem:[#allocation33_spill]]  ;;  %s631_s5 = int_to_ptr.vmem [resolvable:$true] %s630_s5 }
  0x58   : > { %s618_s0 = scalar_lea.sflag [#allocation7], %s617_s14 }
  0x5d   : > { %s627_s18 = scalar_lea.hbm %s3854_s25, %s2448_s4  ;;  %s2928_s16 = scalar_lea.hbm %s3854_s25, 64 }
  0x5e   : > { %s628_s29 = sshll.u32 %s627_s18, 4  ;;  %s629_s29 = int_to_ptr.hbm [resolvable:$true] %s628_s29 }
  0x5f   : > { %s2921_s26 = sshra.s32 %s629_s29, 4  ;;  %s2922_s26 = int_to_ptr.hbm [resolvable:$true] %s2921_s26 }
  0x60   : > { %s2923_s6 = scalar_lea.hbm %s2922_s26, 32  ;;  %p2929_p11 = scmp.lt.s32.totalorder %s2922_s26, %s3854_s25 }
  0x61   : > { %p2924_p4 = scmp.ne.s32.totalorder %s2922_s26, %s2923_s6  ;;  %p2930_p12 = scmp.lt.s32.totalorder %s2928_s16, %s2923_s6 }
  0x63   : > { %p2926_p8 = pnand %p2924_p4, %p2895_p9  ;;  %p2931_p2 = por %p2930_p12, %p2929_p11 }
  0x65   : > { %p2927_p10 = pneg %p2926_p8 }
  0x67   : > { %p2932_p5 = pnand %p2931_p2, %p2927_p10 }
  0x69   : > { %2935 = shalt.err (!%p2932_p5)
}
  0x6a   : > { %2512 = dma.hbm_to_vmem [thread:$0]  (!%p3285_p7), %s629_s29, 512, %s631_s5, %s618_s0, %s3853_s24, %s3853_s24, %s3852_s19  }
  0x6b   : > { %642 = sbr.rel (%p3180_p3) target bundleno = 2356 (0x934), region = 92  ;;  %s3329_s14 = sand.u32 (!%p3180_p3), 1, %s3029_s28  }
  0x6c   : > { %s2395_s27 = sshll.u32 (!%p3180_p3), %s3329_s14, 4  ;;  %s645_s4 = scalar_lea.sflag (!%p3180_p3), [#allocation4], %s3329_s14 }
  0x6d   : > { %s3335_s22 = scalar_lea.vmem (!%p3180_p3), [#allocation3], %s2395_s27 }
  0x70   : > { %2996 = dma.done.wait (%p3262_p13), %s645_s4, 256  }
  0x71   : > { %2998 = vsyncadd (%p3262_p13), %s645_s4, 4294967040  ;;  %s654_s21 = sand.u32 1, %s3175_s20   ;;  %s2396_s15 = sshll.u32 %s3329_s14, 5 }
  0x72   : > { %s655_s19 = scalar_lea.sflag [#allocation7], %s654_s21  ;;  %s658_s24 = scalar_lea.vmem [#allocation6], %s2396_s15 }
  0x73   : > { %3000 = dma.done.wait (%p3262_p13), %s655_s19, 512  }
  0x74   : > { %3002 = vsyncadd (%p3262_p13), %s655_s19, 4294966784 }
  0x75   : > { %3004 = dma.done.wait (%p61_p1), [#allocation7], 16  }
  0x76   : > { %3006 = vsyncadd (%p61_p1), [#allocation7], 4294967280 }
  0x77   : > { %3008 = dma.done.wait (%p61_p1), [#allocation10], 4096  }
  0x78   : > { %3010 = vsyncadd (%p61_p1), [#allocation10], 4294963200 }
  0x79   : > { %3012 = dma.done.wait (%p61_p1), [#allocation13], 4096  }
  0x7a   : > { %3014 = vsyncadd (%p61_p1), [#allocation13], 4294963200 }
  0x7b   : > { %3016 = dma.done.wait (%p61_p1), [#allocation16], 8192  }
  0x7c   : > { %3018 = vsyncadd (%p61_p1), [#allocation16], 4294959104  ;;  %v760_v0 = vld [vmem:[%s658_s24 + $0x18] sm:$0xff]  ;;  %v759_v1 = vld [vmem:[%s658_s24 + $0x10] sm:$0xff]  ;;  %v3050_v6 = vmov 128.0   ;;  %s3855_s18 = sld [smem:[#allocation34_spill]] }
  0x7d   : > { %v757_v2 = vld [vmem:[%s658_s24] sm:$0xff]  ;;  %826 = vadd.xlane.f32.xlu2 %v760_v0  ;;  %824 = vadd.xlane.f32.xlu1 %v759_v1  ;;  %v756_v3 = vld [vmem:[%s3335_s22 + $0x8] sm:$0xff]  ;;  %2621 = vrcp.f32 %v3050_v6  ;;  %s3051_s26 = smov 96   ;;  %s3052_s2 = smov 64  }
  0x7e   : > { %820 = vadd.xlane.f32.xlu0 %v757_v2  ;;  %v755_v4 = vld [vmem:[%s3335_s22] sm:$0xff]  ;;  %v758_v5 = vld [vmem:[%s658_s24 + $0x8] sm:$0xff]  ;;  %s3053_s23 = smov 32   ;;  %s751_s6 = scalar_lea.vmem [#allocation18], %s2395_s27 }
  0x7f   : > { %v968_v11 = vld [vmem:[#allocation11 + $0x78] sm:$0xff]  ;;  %v967_v13 = vld [vmem:[#allocation11 + $0x70] sm:$0xff]  ;;  %v966_v41 = vld [vmem:[#allocation11 + $0x68] sm:$0xff]  ;;  %s2449_s3 = sshll.u32 %s3175_s20, 4  ;;  %s2212_s21 = sshll.u32 %s751_s6, 4  ;;  %s2213_s21 = int_to_ptr.vmem [resolvable:$true] %s2212_s21 }
  0x80   : > { %v1017_v12 = vld [vmem:[#allocation12 + $0x78] sm:$0xff]  ;;  %973 = vmatpush.msra.mxu1 %v968_v11  ;;  %v1016_v14 = vld [vmem:[#allocation12 + $0x70] sm:$0xff]  ;;  %v1015_v42 = vld [vmem:[#allocation12 + $0x68] sm:$0xff]  ;;  %s2200_s15 = scalar_lea.sflag [#allocation5], %s3329_s14 }
  0x81   : > { %1022 = vmatpush.msra.mxu2 %v1017_v12  ;;  %v965_v43 = vld [vmem:[#allocation11 + $0x60] sm:$0xff]  ;;  %v923_v45 = vld [vmem:[#allocation9 + $0x78] sm:$0xff]  ;;  %v922_v48 = vld [vmem:[#allocation9 + $0x70] sm:$0xff] }
  0x82   : > { %974 = vmatpush.msra.mxu1 %v967_v13  ;;  %v1014_v44 = vld [vmem:[#allocation12 + $0x60] sm:$0xff]  ;;  %v964_v46 = vld [vmem:[#allocation11 + $0x58] sm:$0xff]  ;;  %928 = vmatpush.msra.mxu0 %v923_v45  ;;  %v963_v49 = vld [vmem:[#allocation11 + $0x50] sm:$0xff] }
  0x83   : > { %v2622_v7 = vpop.eup %2621  ;;  %1023 = vmatpush.msra.mxu2 %v1016_v14  ;;  %v1013_v47 = vld [vmem:[#allocation12 + $0x58] sm:$0xff]  ;;  %v1012_v50 = vld [vmem:[#allocation12 + $0x50] sm:$0xff]  ;;  %v921_v51 = vld [vmem:[#allocation9 + $0x68] sm:$0xff] }
  0x84   : > { %v768_v8 = vmul.f32 128.0, %v2622_v7  ;;  %vm772_vm0 = vweird.f32 %v2622_v7  ;;  %975 = vmatpush.msra.mxu1 %v966_v41  ;;  %929 = vmatpush.msra.mxu0 %v922_v48  ;;  %v962_v52 = vld [vmem:[#allocation11 + $0x48] sm:$0xff]  ;;  %v920_v54 = vld [vmem:[#allocation9 + $0x60] sm:$0xff]  ;;  %v919_v57 = vld [vmem:[#allocation9 + $0x58] sm:$0xff] }
  0x85   : > { %765 = vadd.xlane.f32.xlu2 %v756_v3  ;;  %763 = vadd.xlane.f32.xlu1 %v755_v4  ;;  %v1011_v53 = vld [vmem:[#allocation12 + $0x48] sm:$0xff]  ;;  %v961_v55 = vld [vmem:[#allocation11 + $0x40] sm:$0xff]  ;;  %v960_v58 = vld [vmem:[#allocation11 + $0x38] sm:$0xff] }
  0x86   : > { %822 = vadd.xlane.f32.xlu0 %v758_v5  ;;  %v769_v9 = vsub.f32 1.0, %v768_v8  ;;  %1024 = vmatpush.msra.mxu2 %v1015_v42  ;;  %v1010_v56 = vld [vmem:[#allocation12 + $0x40] sm:$0xff]  ;;  %v1009_v59 = vld [vmem:[#allocation12 + $0x38] sm:$0xff]  ;;  %v918_v60 = vld [vmem:[#allocation9 + $0x50] sm:$0xff] }
  0x87   : > { %976 = vmatpush.msra.mxu1 %v965_v43  ;;  %930 = vmatpush.msra.mxu0 %v921_v51  ;;  %v959_v61 = vld [vmem:[#allocation11 + $0x30] sm:$0xff]  ;;  %v917_v63 = vld [vmem:[#allocation9 + $0x48] sm:$0xff]  ;;  %v956_v6 = vld [vmem:[#allocation11 + $0x18] sm:$0xff] }
  0x88   : > { %v770_v10 = vmul.f32 %v2622_v7, %v769_v9  ;;  %1025 = vmatpush.msra.mxu2 %v1014_v44  ;;  %v1008_v62 = vld [vmem:[#allocation12 + $0x30] sm:$0xff]  ;;  %v913_v11 = vld [vmem:[#allocation9 + $0x28] sm:$0xff]  ;;  %v912_v14 = vld [vmem:[#allocation9 + $0x20] sm:$0xff] }
  0x89   : > { %977 = vmatpush.msra.mxu1 %v964_v46  ;;  %931 = vmatpush.msra.mxu0 %v920_v54  ;;  %v914_v8 = vld [vmem:[#allocation9 + $0x30] sm:$0xff]  ;;  %v954_v12 = vld [vmem:[#allocation11 + $0x8] sm:$0xff] }
  0x8a   : > { %v771_v15 = vadd.f32 %v2622_v7, %v770_v10  ;;  %1026 = vmatpush.msra.mxu2 %v1013_v47  ;;  %v955_v9 = vld [vmem:[#allocation11 + $0x10] sm:$0xff]  ;;  %v1003_v13 = vld [vmem:[#allocation12 + $0x8] sm:$0xff] }
  0x8b   : > { %978 = vmatpush.msra.mxu1 %v963_v49  ;;  %932 = vmatpush.msra.mxu0 %v919_v57  ;;  %v1004_v10 = vld [vmem:[#allocation12 + $0x10] sm:$0xff] }
  0x8c   : > { %v3365_v16 = vsel %vm772_vm0, %v2622_v7, %v771_v15  ;;  %1027 = vmatpush.msra.mxu2 %v1012_v50  ;;  %v1005_v7 = vld [vmem:[#allocation12 + $0x18] sm:$0xff]  ;;  %v953_v15 = vld [vmem:[#allocation11] sm:$0xff] }
  0x8d   : > { %979 = vmatpush.msra.mxu1 %v962_v52  ;;  %933 = vmatpush.msra.mxu0 %v918_v60 }
  0x8e   : > { %1028 = vmatpush.msra.mxu2 %v1011_v53 }
  0x8f   : > { %980 = vmatpush.msra.mxu1 %v961_v55  ;;  %934 = vmatpush.msra.mxu0 %v917_v63  ;;  %v3421_v63 = vld [vmem:[%s3855_s18] ss:$0 sm:$0xff]  ;;  %s3858_s18 = sld [smem:[#allocation41_spill]] }
  0x90   : > { %1029 = vmatpush.msra.mxu2 %v1010_v56 }
  0x91   : > { %981 = vmatpush.msra.mxu1 %v960_v58 }
  0x92   : > { %1030 = vmatpush.msra.mxu2 %v1009_v59 }
  0x93   : > { %982 = vmatpush.msra.mxu1 %v959_v61 }
  0x94   : > { %1031 = vmatpush.msra.mxu2 %v1008_v62 }
  0xf0   : > { %v827_v17 = vpop.xlane.xlu2 %826  ;;  %v825_v18 = vpop.xlane.xlu1 %824 }
  0xf1   : > { %v830_v19 = vmul.f32 %v825_v18, %v3365_v16  ;;  %v821_v20 = vpop.xlane.xlu0 %820  ;;  %v831_v34 = vmul.f32 %v827_v17, %v3365_v16  ;;  %v1002_v17 = vld [vmem:[#allocation12] sm:$0xff]  ;;  %v911_v18 = vld [vmem:[#allocation9 + $0x18] sm:$0xff] }
  0xf2   : > { %v828_v21 = vmul.f32 %v821_v20, %v3365_v16 }
  0xf3   : > { %v3369_v22 = vsub.f32 %v759_v1, %v830_v19  ;;  %v3393_v39 = vsub.f32 %v760_v0, %v831_v34  ;;  %v958_v0 = vld [vmem:[#allocation11 + $0x28] sm:$0xff] }
  0xf4   : > { %v3371_v23 = vsub.f32 %v757_v2, %v828_v21  ;;  %v1007_v1 = vld [vmem:[#allocation12 + $0x28] sm:$0xff]  ;;  %983 = vmatpush.msra.mxu1 %v958_v0  ;;  %v916_v2 = vld [vmem:[#allocation9 + $0x40] sm:$0xff] }
  0xf5   : > { %v838_v24 = vmul.f32 %v3369_v22, %v3369_v22  ;;  %v839_v40 = vmul.f32 %v3393_v39, %v3393_v39  ;;  %1032 = vmatpush.msra.mxu2 %v1007_v1  ;;  %935 = vmatpush.msra.mxu0 %v916_v2 }
  0xf6   : > { %v836_v25 = vmul.f32 %v3371_v23, %v3371_v23 }
  0xf7   : > { %844 = vadd.xlane.f32.xlu2 %v838_v24  ;;  %v910_v24 = vld [vmem:[#allocation9 + $0x10] sm:$0xff] }
  0xf8   : > { %840 = vadd.xlane.f32.xlu0 %v836_v25  ;;  %v766_v26 = vpop.xlane.xlu2 %765  ;;  %v764_v27 = vpop.xlane.xlu1 %763 }
  0xf9   : > { %v823_v28 = vpop.xlane.xlu0 %822  ;;  %v775_v29 = vmul.f32 %v3365_v16, %v766_v26  ;;  %v774_v30 = vmul.f32 %v3365_v16, %v764_v27  ;;  %v909_v27 = vld [vmem:[#allocation9 + $0x8] sm:$0xff] }
  0xfa   : > { %v829_v31 = vmul.f32 %v823_v28, %v3365_v16 }
  0xfb   : > { %v3380_v32 = vsub.f32 %v756_v3, %v775_v29  ;;  %v3382_v33 = vsub.f32 %v755_v4, %v774_v30  ;;  %v957_v3 = vld [vmem:[#allocation11 + $0x20] sm:$0xff] }
  0xfc   : > { %v3385_v35 = vsub.f32 %v758_v5, %v829_v31  ;;  %v1006_v4 = vld [vmem:[#allocation12 + $0x20] sm:$0xff]  ;;  %984 = vmatpush.msra.mxu1 %v957_v3  ;;  %v915_v5 = vld [vmem:[#allocation9 + $0x38] sm:$0xff] }
  0xfd   : > { %v779_v36 = vmul.f32 %v3380_v32, %v3380_v32  ;;  %v778_v37 = vmul.f32 %v3382_v33, %v3382_v33  ;;  %1033 = vmatpush.msra.mxu2 %v1006_v4  ;;  %936 = vmatpush.msra.mxu0 %v915_v5  ;;  %v908_v29 = vld [vmem:[#allocation9] sm:$0xff]  ;;  %v2613_v4 = vld [vmem:[#allocation8] ss:$0 sm:$0xff] }
  0xfe   : > { %v837_v38 = vmul.f32 %v3385_v35, %v3385_v35  ;;  %985 = vmatpush.msra.mxu1 %v956_v6 }
  0xff   : > { %782 = vadd.xlane.f32.xlu2 %v779_v36  ;;  %1034 = vmatpush.msra.mxu2 %v1005_v7 }
 0x100   : > { %842 = vadd.xlane.f32.xlu1 %v837_v38  ;;  %780 = vadd.xlane.f32.xlu0 %v778_v37 }
 0x101   : > { %937 = vmatpush.msra.mxu0 %v914_v8  ;;  %986 = vmatpush.msra.mxu1 %v955_v9 }
 0x102   : > { %1035 = vmatpush.msra.mxu2 %v1004_v10 }
 0x103   : > { %938 = vmatpush.msra.mxu0 %v913_v11  ;;  %987 = vmatpush.msra.mxu1 %v954_v12 }
 0x104   : > { %1036 = vmatpush.msra.mxu2 %v1003_v13 }
 0x105   : > { %939 = vmatpush.msra.mxu0 %v912_v14  ;;  %988 = vmatpush.msra.mxu1 %v953_v15 }
 0x106   : > { %1037 = vmatpush.msra.mxu2 %v1002_v17 }
 0x107   : > { %940 = vmatpush.msra.mxu0 %v911_v18 }
 0x108   : > { %846 = vadd.xlane.f32.xlu1 %v839_v40 }
 0x109   : > { %941 = vmatpush.msra.mxu0 %v910_v24 }
 0x10b   : > { %942 = vmatpush.msra.mxu0 %v909_v27 }
 0x10d   : > { %943 = vmatpush.msra.mxu0 %v908_v29 }
 0x16a   : > { %v845_v19 = vpop.xlane.xlu2 %844 }
 0x16b   : > { %v841_v20 = vpop.xlane.xlu0 %840  ;;  %v850_v21 = vmul.f32 %v845_v19, %v3365_v16 }
 0x16c   : > { %v848_v25 = vmul.f32 %v841_v20, %v3365_v16 }
 0x16d   : > { %v3399_v26 = vadd.f32 1e-05, %v850_v21 }
 0x16e   : > { %v852_v28 = vadd.f32 1e-05, %v848_v25 }
 0x16f   : > { %2623 = vrsqrt.f32 %v3399_v26  ;;  %vm882_vm9 = vweird.f32 %v3399_v26 }
 0x170   : > { %2625 = vrsqrt.f32 %v852_v28  ;;  %vm862_vm2 = vweird.f32 %v852_v28 }
 0x172   : > { %v783_v30 = vpop.xlane.xlu2 %782 }
 0x173   : > { %v785_v31 = vmul.f32 %v783_v30, %v3365_v16  ;;  %v781_v34 = vpop.xlane.xlu0 %780  ;;  %v843_v36 = vpop.xlane.xlu1 %842 }
 0x174   : > { %v784_v37 = vmul.f32 %v781_v34, %v3365_v16  ;;  %v849_v38 = vmul.f32 %v843_v36, %v3365_v16 }
 0x175   : > { %v3405_v40 = vpop.eup %2623  ;;  %v787_v41 = vadd.f32 1e-05, %v785_v31 }
 0x176   : > { %v2626_v42 = vpop.eup %2625  ;;  %v786_v43 = vadd.f32 1e-05, %v784_v37  ;;  %v853_v44 = vadd.f32 1e-05, %v849_v38  ;;  %v877_v46 = vmul.f32 %v3405_v40, %v3399_v26  ;;  %vm883_vm11 = vweird.f32 %v3405_v40 }
 0x177   : > { %v857_v45 = vmul.f32 %v2626_v42, %v852_v28  ;;  %2627 = vrsqrt.f32 %v787_v41  ;;  %vm863_vm1 = vweird.f32 %v2626_v42  ;;  %vm804_vm4 = vweird.f32 %v787_v41  ;;  %vm884_vm15 = vmor %vm882_vm9, %vm883_vm11 }
 0x178   : > { %2629 = vrsqrt.f32 %v786_v43  ;;  %v878_v49 = vmul.f32 %v3405_v40, %v877_v46  ;;  %vm864_vm3 = vmor %vm862_vm2, %vm863_vm1  ;;  %vm794_vm6 = vweird.f32 %v786_v43  ;;  %vm872_vm13 = vweird.f32 %v853_v44 }
 0x179   : > { %v858_v47 = vmul.f32 %v2626_v42, %v857_v45  ;;  %2631 = vrsqrt.f32 %v853_v44 }
 0x17a   : > { %v879_v59 = vmul.f32 0.5, %v878_v49 }
 0x17b   : > { %v859_v48 = vmul.f32 0.5, %v858_v47  ;;  %v847_v50 = vpop.xlane.xlu1 %846  ;;  %v2614_v47 = vld [vmem:[%s3793_s8] ss:$0 sm:$0xff] }
 0x17c   : > { %v851_v51 = vmul.f32 %v847_v50, %v3365_v16  ;;  %v880_v6 = vsub.f32 1.5, %v879_v59 }
 0x17d   : > { %v3411_v52 = vpop.eup %2627  ;;  %v860_v53 = vsub.f32 1.5, %v859_v48 }
 0x17e   : > { %v2630_v54 = vpop.eup %2629  ;;  %v799_v55 = vmul.f32 %v3411_v52, %v787_v41  ;;  %v3414_v56 = vadd.f32 1e-05, %v851_v51  ;;  %vm805_vm5 = vweird.f32 %v3411_v52  ;;  %v881_v19 = vmul.f32 %v3405_v40, %v880_v6 }
 0x17f   : > { %v2632_v57 = vpop.eup %2631  ;;  %v861_v58 = vmul.f32 %v2626_v42, %v860_v53  ;;  %v789_v60 = vmul.f32 %v2630_v54, %v786_v43  ;;  %vm795_vm7 = vweird.f32 %v2630_v54  ;;  %vm3429_vm10 = vmor %vm804_vm4, %vm805_vm5  ;;  %vm1110_vm4 = vcmask 130048  }
 0x180   : > { %v800_v61 = vmul.f32 %v3411_v52, %v799_v55  ;;  %v867_v62 = vmul.f32 %v2632_v57, %v853_v44  ;;  %2633 = vrsqrt.f32 %v3414_v56  ;;  %vm873_vm8 = vweird.f32 %v2632_v57  ;;  %vm796_vm12 = vmor %vm794_vm6, %vm795_vm7 }
 0x181   : > { %v790_v0 = vmul.f32 %v2630_v54, %v789_v60  ;;  %v865_v1 = vsel %vm864_vm3, %v2626_v42, %v861_v58  ;;  %vm874_vm14 = vmor %vm872_vm13, %vm873_vm8  ;;  %v885_v34 = vsel %vm884_vm15, %v3405_v40, %v881_v19  ;;  %vm892_vm1 = vweird.f32 %v3414_v56 }
 0x182   : > { %v801_v2 = vmul.f32 0.5, %v800_v61  ;;  %v868_v3 = vmul.f32 %v2632_v57, %v867_v62  ;;  %v896_v5 = vmul.f32 %v865_v1, %v3371_v23  ;;  %v898_v26 = vmul.f32 %v885_v34, %v3369_v22 }
 0x183   : > { %v791_v7 = vmul.f32 0.5, %v790_v0  ;;  %vm1051_vm3 = vcmask 261120  }
 0x184   : > { %v802_v8 = vsub.f32 1.5, %v801_v2  ;;  %v869_v9 = vmul.f32 0.5, %v868_v3  ;;  %v900_v10 = vmul.f32 %v3421_v63, %v896_v5  ;;  %v902_v40 = vmul.f32 %v3421_v63, %v898_v26 }
 0x185   : > { %v792_v11 = vsub.f32 1.5, %v791_v7 }
 0x186   : > { %v2634_v12 = vpop.eup %2633  ;;  %v870_v13 = vsub.f32 1.5, %v869_v9  ;;  %v904_v14 = vadd.f32 %v2613_v4, %v900_v10  ;;  %v803_v23 = vmul.f32 %v3411_v52, %v802_v8  ;;  %v906_v45 = vadd.f32 %v2613_v4, %v902_v40 }
 0x187   : > { %v793_v17 = vmul.f32 %v2630_v54, %v792_v11  ;;  %v887_v18 = vmul.f32 %v2634_v12, %v3414_v56  ;;  %vm893_vm0 = vweird.f32 %v2634_v12 }
 0x188   : > { %v871_v20 = vmul.f32 %v2632_v57, %v870_v13  ;;  %989 = vmatmul.f32.vlgmr.msra.gmra.mxu1 %v904_v14  ;;  %1038 = vmatmul.f32.vlgmr.msra.gmra.mxu2 %v904_v14  ;;  %v807_v30 = vsel %vm3429_vm10, %v3411_v52, %v803_v23  ;;  %vm894_vm2 = vmor %vm892_vm1, %vm893_vm0 }
 0x189   : > { %v888_v21 = vmul.f32 %v2634_v12, %v887_v18  ;;  %v797_v24 = vsel %vm796_vm12, %v2630_v54, %v793_v17  ;;  %v2615_v54 = vld [vmem:[%s3794_s9] ss:$0 sm:$0xff] }
 0x18a   : > { %v808_v25 = vmul.f32 %v797_v24, %v3382_v33  ;;  %v875_v27 = vsel %vm874_vm14, %v2632_v57, %v871_v20  ;;  %v809_v33 = vmul.f32 %v807_v30, %v3380_v32 }
 0x18b   : > { %v889_v28 = vmul.f32 0.5, %v888_v21  ;;  %v897_v29 = vmul.f32 %v875_v27, %v3385_v35 }
 0x18c   : > { %v813_v31 = vmul.f32 %v3421_v63, %v808_v25  ;;  %v814_v35 = vmul.f32 %v3421_v63, %v809_v33 }
 0x18d   : > { %v890_v36 = vsub.f32 1.5, %v889_v28  ;;  %v901_v37 = vmul.f32 %v3421_v63, %v897_v29 }
 0x18e   : > { %v818_v38 = vadd.f32 %v2613_v4, %v813_v31  ;;  %v819_v44 = vadd.f32 %v2613_v4, %v814_v35 }
 0x18f   : > { %v905_v41 = vadd.f32 %v2613_v4, %v901_v37  ;;  %v891_v42 = vmul.f32 %v2634_v12, %v890_v36 }
 0x190   : > { %944 = vmatmul.f32.vlgmr.msra.gmra.mxu0 %v818_v38 }
 0x191   : > { %992 = vmatmul.f32.gmra.mxu1 %v905_v41  ;;  %1041 = vmatmul.f32.gmra.mxu2 %v905_v41  ;;  %v895_v43 = vsel %vm894_vm2, %v2634_v12, %v891_v42 }
 0x192   : > { %v899_v32 = vmul.f32 %v895_v43, %v3393_v39  ;;  %v2616_v39 = vld [vmem:[%s3792_s7] ss:$0 sm:$0xff] }
 0x194   : > { %v903_v22 = vmul.f32 %v3421_v63, %v899_v32 }
 0x196   : > { %v907_v46 = vadd.f32 %v2613_v4, %v903_v22 }
 0x198   : > { %947 = vmatmul.f32.gmra.mxu0 %v819_v44 }
 0x199   : > { %995 = vmatmul.f32.gmra.mxu1 %v906_v45  ;;  %1044 = vmatmul.f32.gmra.mxu2 %v906_v45 }
 0x1a1   : > { %998 = vmatmul.f32.gmra.mxu1 %v907_v46  ;;  %1047 = vmatmul.f32.gmra.mxu2 %v907_v46 }
 0x205   : > { %v990_v48 = vpop.f32.mrf.mxu1 }
 0x206   : > { %v991_v49 = vadd.f32 %v2614_v47, %v990_v48 }
 0x208   : > { %1209 = vrot.lane.b32.xlu0 %v991_v49, %s3051_s26 }
 0x20b   : > { %v1039_v50 = vpop.f32.mrf.mxu2 }
 0x20c   : > { %v1040_v57 = vadd.f32 %v2615_v54, %v1039_v50 }
 0x20d   : > { %v945_v52 = vpop.f32.mrf.mxu0 }
 0x20e   : > { %v993_v51 = vpop.f32.mrf.mxu1  ;;  %v946_v55 = vadd.f32 %v2616_v39, %v945_v52 }
 0x20f   : > { %v994_v53 = vadd.f32 %v2614_v47, %v993_v51 }
 0x210   : > { %v951_v59 = vmul.f32 0.17677669, %v946_v55 }
 0x211   : > { %1211 = vrot.lane.b32.xlu2 %v994_v53, %s3051_s26  ;;  %2405 = vmatpush.xpose.msk.msrb.mxu0 %vm1051_vm3, %v994_v53 }
 0x214   : > { %v1042_v56 = vpop.f32.mrf.mxu2 }
 0x215   : > { %v1043_v58 = vadd.f32 %v2615_v54, %v1042_v56  ;;  %2406 = vmatpush.xpose.msk.msrb.mxu0 %vm1051_vm3, %v991_v49  ;;  %v948_v0 = vpop.f32.mrf.mxu0 }
 0x216   : > { %v996_v60 = vpop.f32.mrf.mxu1  ;;  %v949_v2 = vadd.f32 %v2616_v39, %v948_v0 }
 0x217   : > { %1146 = vmatpush.msra.mxu3 %v1043_v58  ;;  %v3466_v61 = vpack.i.bf16 %v1040_v57, %v1043_v58  ;;  %v997_v3 = vadd.f32 %v2614_v47, %v996_v60 }
 0x218   : > { %2407 = vmatmul.msk.f32.vlgmr.msrb.gmra.mxu0 %vm1051_vm3, %v951_v59  ;;  %v3476_v7 = vmul.f32 0.17677669, %v949_v2 }
 0x219   : > { %1147 = vmatpush.msra.mxu3 %v1040_v57 }
 0x21c   : > { %v1045_v62 = vpop.f32.mrf.mxu2 }
 0x21d   : > { %v1046_v5 = vadd.f32 %v2615_v54, %v1045_v62 }
 0x21e   : > { %v999_v63 = vpop.f32.mrf.mxu1 }
 0x21f   : > { %v3469_v1 = vadd.f32 %v2614_v47, %v999_v63 }
 0x221   : > { %1243 = vrot.lane.b32.xlu2 %v3469_v1, %s3051_s26  ;;  %2408 = vmatpush.xpose.msk.msrb.mxu1 %vm1051_vm3, %v3469_v1 }
 0x224   : > { %v1048_v4 = vpop.f32.mrf.mxu2 }
 0x225   : > { %v1049_v6 = vadd.f32 %v2615_v54, %v1048_v4  ;;  %2409 = vmatpush.xpose.msk.msrb.mxu1 %vm1051_vm3, %v997_v3 }
 0x227   : > { %1169 = vmatpush.msrb.mxu3 %v1049_v6  ;;  %v3478_v8 = vpack.i.bf16 %v1046_v5, %v1049_v6 }
 0x228   : > { %2410 = vmatmul.msk.f32.vlgmr.msrb.gmra.mxu1 %vm1051_vm3, %v3476_v7 }
 0x229   : > { %1170 = vmatpush.msrb.mxu3 %v1046_v5  ;;  %1239 = vrot.lane.b32.xlu2 %v3476_v7, %s3051_s26 }
 0x231   : > { %2583 = vrot.lane.b32.xlu2 %v3466_v61, %s3051_s26 }
 0x239   : > { %1396 = vrot.lane.b32.xlu2 %v994_v53, %s3052_s2 }
 0x241   : > { %2588 = vrot.lane.b32.xlu2 %v3478_v8, %s3051_s26 }
 0x249   : > { %1394 = vrot.lane.b32.xlu2 %v991_v49, %s3052_s2 }
 0x251   : > { %1392 = vrot.lane.b32.xlu2 %v951_v59, %s3052_s2 }
 0x259   : > { %1426 = vrot.lane.b32.xlu2 %v997_v3, %s3052_s2 }
 0x261   : > { %1575 = vrot.lane.b32.xlu2 %v991_v49, %s3053_s23 }
 0x269   : > { %1424 = vrot.lane.b32.xlu2 %v3476_v7, %s3052_s2 }
 0x26b   : > { %v1212_v9 = vpop.permute.xlu2 %1211 }
 0x271   : > { %1607 = vrot.lane.b32.xlu2 %v997_v3, %s3053_s23 }
 0x27a   : > { %v1210_v15 = vpop.permute.xlu0 %1209 }
 0x27b   : > { %v1244_v10 = vpop.permute.xlu2 %1243 }
 0x27c   : > { %2416 = vmatpush.xpose.msk.msra.mxu0 %vm1051_vm3, %v1244_v10 }
 0x283   : > { %v1240_v23 = vpop.permute.xlu2 %1239 }
 0x28b   : > { %v2584_v17 = vpop.permute.xlu2 %2583 }
 0x28c   : > { %v2585_v37 = vunpack.i.l.bf16 %v2584_v17  ;;  %v2586_v38 = vunpack.i.h.bf16 %v2584_v17 }
 0x293   : > { %v1397_v21 = vpop.permute.xlu2 %1396 }
 0x295   : > { %v1078_v11 = vpop.f32.mrf.mxu0 }
 0x296   : > { %v1111_v12 = vsel %vm1110_vm4, %v1078_v11, -inf }
 0x297   : > { %1112 = vmax.xlane.f32.xlu0 %v1111_v12 }
 0x29b   : > { %v2589_v25 = vpop.permute.xlu2 %2588 }
 0x29c   : > { %v2590_v29 = vunpack.i.l.bf16 %v2589_v25  ;;  %v2591_v34 = vunpack.i.h.bf16 %v2589_v25 }
 0x2a3   : > { %v1395_v33 = vpop.permute.xlu2 %1394 }
 0x2a5   : > { %v1107_v13 = vpop.f32.mrf.mxu1 }
 0x2a6   : > { %v1114_v14 = vsel %vm1110_vm4, %v1107_v13, -inf }
 0x2a7   : > { %1115 = vmax.xlane.f32.xlu1 %v1114_v14 }
 0x2ab   : > { %1241 = vrot.lane.b32.xlu0 %v997_v3, %s3051_s26  ;;  %v1393_v26 = vpop.permute.xlu2 %1392 }
 0x2b3   : > { %1577 = vrot.lane.b32.xlu0 %v994_v53, %s3053_s23  ;;  %v1427_v35 = vpop.permute.xlu2 %1426 }
 0x2bb   : > { %1573 = vrot.lane.b32.xlu0 %v951_v59, %s3053_s23  ;;  %v1576_v39 = vpop.permute.xlu2 %1575 }
 0x2c0   : > { %1207 = vrot.lane.b32.xlu1 %v951_v59, %s3051_s26 }
 0x2c3   : > { %v1425_v52 = vpop.permute.xlu2 %1424 }
 0x2c8   : > { %1428 = vrot.lane.b32.xlu1 %v3469_v1, %s3052_s2 }
 0x2cb   : > { %v1608_v58 = vpop.permute.xlu2 %1607 }
 0x30a   : > { %v1113_v18 = vpop.xlane.xlu0 %1112 }
 0x30b   : > { %v1117_v19 = vsub.f32 %v1078_v11, %v1113_v18 }
 0x30d   : > { %v1119_v20 = vmul.f32 1.442695, %v1117_v19 }
 0x30f   : > { %2635 = vpow2.f32 %v1119_v20 }
 0x315   : > { %v3505_v24 = vpop.eup %2635 }
 0x316   : > { %2411 = vmatmul.msk.f32.vlgmr.msra.gmra.mxu3 %vm1110_vm4, %v3505_v24 }
 0x317   : > { %2413 = vmatpush.xpose.msk.msra.mxu3 %vm1051_vm3, %v1212_v9 }
 0x31a   : > { %v1116_v27 = vpop.xlane.xlu1 %1115 }
 0x31b   : > { %2414 = vmatpush.xpose.msk.msra.mxu3 %vm1051_vm3, %v1210_v15  ;;  %v1118_v28 = vsub.f32 %v1107_v13, %v1116_v27 }
 0x31d   : > { %v1121_v30 = vmul.f32 1.442695, %v1118_v28  ;;  %v1242_v31 = vpop.permute.xlu0 %1241 }
 0x31e   : > { %2417 = vmatpush.xpose.msk.msra.mxu0 %vm1051_vm3, %v1242_v31 }
 0x31f   : > { %2637 = vpow2.f32 %v1121_v30 }
 0x321   : > { %2418 = vmatmul.msk.f32.vlgmr.msra.gmra.mxu0 %vm1051_vm3, %v1240_v23 }
 0x322   : > { %1345 = vmatpush.msrb.mxu0 %v2590_v29 }
 0x324   : > { %1346 = vmatpush.msrb.mxu0 %v2591_v34 }
 0x325   : > { %v3513_v36 = vpop.eup %2637  ;;  %v1578_v46 = vpop.permute.xlu0 %1577 }
 0x326   : > { %2412 = vmatmul.msk.f32.vlgmr.msrb.gmra.mxu3 %vm1110_vm4, %v3513_v36 }
 0x327   : > { %1314 = vmatpush.msrb.mxu3 %v2585_v37 }
 0x329   : > { %1315 = vmatpush.msrb.mxu3 %v2586_v38 }
 0x32d   : > { %v1574_v47 = vpop.permute.xlu0 %1573 }
 0x332   : > { %v1208_v41 = vpop.permute.xlu1 %1207 }
 0x333   : > { %2415 = vmatmul.msk.f32.vlgmr.msra.gmra.mxu3 %vm1051_vm3, %v1208_v41 }
 0x334   : > { %2421 = vmatpush.xpose.msk.msra.mxu3 %vm1051_vm3, %v1397_v21 }
 0x338   : > { %2422 = vmatpush.xpose.msk.msra.mxu3 %vm1051_vm3, %v1395_v33 }
 0x33a   : > { %v1429_v42 = vpop.permute.xlu1 %1428 }
 0x33b   : > { %2424 = vmatpush.xpose.msk.msra.mxu0 %vm1051_vm3, %v1429_v42 }
 0x33f   : > { %2425 = vmatpush.xpose.msk.msra.mxu0 %vm1051_vm3, %v1427_v35  ;;  %v1123_v35 = vsel %vm1110_vm4, %v3505_v24, 0.0 }
 0x399   : > { %v3523_v44 = vpop.f32.mrf.mxu3 }
 0x39e   : > { %v1268_v40 = vpop.f32.mrf.mxu0 }
 0x39f   : > { %v1274_v43 = vsel %vm1110_vm4, %v1268_v40, -inf }
 0x3a0   : > { %1275 = vmax.xlane.f32.xlu0 %v1274_v43 }
 0x3a9   : > { %v3525_v45 = vpop.f32.mrf.mxu3 }
 0x3b4   : > { %1605 = vrot.lane.b32.xlu0 %v3476_v7, %s3053_s23 }
 0x3b6   : > { %v1236_v32 = vpop.f32.mrf.mxu3 }
 0x3b7   : > { %v1271_v22 = vsel %vm1110_vm4, %v1236_v32, -inf }
 0x3b8   : > { %1272 = vmax.xlane.f32.xlu1 %v1271_v22 }
 0x3d1   : > { %1609 = vrot.lane.b32.xlu1 %v3469_v1, %s3053_s23 }
 0x3d9   : > { %2593 = vrot.lane.b32.xlu1 %v3466_v61, %s3052_s2 }
 0x413   : > { %v1276_v48 = vpop.xlane.xlu0 %1275 }
 0x414   : > { %v1278_v49 = vsub.f32 %v1268_v40, %v1276_v48  ;;  %v1126_v40 = vsel %vm1110_vm4, %v3513_v36, 0.0 }
 0x416   : > { %v1281_v50 = vmul.f32 1.442695, %v1278_v49 }
 0x418   : > { %2639 = vpow2.f32 %v1281_v50 }
 0x41e   : > { %v2640_v51 = vpop.eup %2639 }
 0x41f   : > { %2420 = vmatmul.msk.f32.vlgmr.msrb.gmra.mxu0 %vm1110_vm4, %v2640_v51  ;;  %v1286_v12 = vsel %vm1110_vm4, %v2640_v51, 0.0 }
 0x426   : > { %v1606_v59 = vpop.permute.xlu0 %1605 }
 0x427   : > { %2426 = vmatmul.msk.f32.vlgmr.msra.gmra.mxu0 %vm1051_vm3, %v1425_v52 }
 0x42b   : > { %v1273_v53 = vpop.xlane.xlu1 %1272 }
 0x42c   : > { %v1277_v54 = vsub.f32 %v1236_v32, %v1273_v53 }
 0x42e   : > { %v1279_v55 = vmul.f32 1.442695, %v1277_v54 }
 0x430   : > { %2641 = vpow2.f32 %v1279_v55 }
 0x436   : > { %v2642_v56 = vpop.eup %2641 }
 0x437   : > { %2419 = vmatmul.msk.f32.vlgmr.msrb.gmra.mxu3 %vm1110_vm4, %v2642_v56  ;;  %v1283_v11 = vsel %vm1110_vm4, %v2642_v56, 0.0 }
 0x438   : > { %2429 = vmatpush.xpose.msk.msrb.mxu3 %vm1051_vm3, %v1578_v46 }
 0x43c   : > { %2430 = vmatpush.xpose.msk.msrb.mxu3 %vm1051_vm3, %v1576_v39 }
 0x43f   : > { %2423 = vmatmul.msk.f32.vlgmr.msra.gmra.mxu3 %vm1051_vm3, %v1393_v26 }
 0x443   : > { %v1610_v57 = vpop.permute.xlu1 %1609 }
 0x444   : > { %2432 = vmatpush.xpose.msk.msrb.mxu0 %vm1051_vm3, %v1610_v57 }
 0x447   : > { %2431 = vmatmul.msk.f32.vlgmr.msrb.gmra.mxu3 %vm1051_vm3, %v1574_v47 }
 0x448   : > { %2433 = vmatpush.xpose.msk.msrb.mxu0 %vm1051_vm3, %v1608_v58 }
 0x44b   : > { %2434 = vmatmul.msk.f32.vlgmr.msrb.gmra.mxu0 %vm1051_vm3, %v1606_v59  ;;  %v2594_v60 = vpop.permute.xlu1 %2593 }
 0x44c   : > { %v2595_v62 = vunpack.i.l.bf16 %v2594_v60  ;;  %v2596_v63 = vunpack.i.h.bf16 %v2594_v60 }
 0x44e   : > { %1497 = vmatpush.msra.mxu1 %v2595_v62 }
 0x450   : > { %1498 = vmatpush.msra.mxu1 %v2596_v63 }
 0x49c   : > { %v3544_v0 = vpop.f32.mrf.mxu0 }
 0x4a4   : > { %v1453_v1 = vpop.f32.mrf.mxu0 }
 0x4a5   : > { %v1459_v2 = vsel %vm1110_vm4, %v1453_v1, -inf }
 0x4a6   : > { %1460 = vmax.xlane.f32.xlu2 %v1459_v2 }
 0x4ba   : > { %v3547_v3 = vpop.f32.mrf.mxu3 }
 0x4c2   : > { %v1421_v4 = vpop.f32.mrf.mxu3 }
 0x4c3   : > { %v1456_v5 = vsel %vm1110_vm4, %v1421_v4, -inf }
 0x4c4   : > { %1457 = vmax.xlane.f32.xlu1 %v1456_v5 }
 0x4c8   : > { %v1634_v6 = vpop.f32.mrf.mxu0 }
 0x4c9   : > { %v1640_v7 = vsel %vm1110_vm4, %v1634_v6, -inf }
 0x4ca   : > { %v1602_v9 = vpop.f32.mrf.mxu3  ;;  %1641 = vmax.xlane.f32.xlu2 %v1640_v7 }
 0x4cb   : > { %v1637_v10 = vsel %vm1110_vm4, %v1602_v9, -inf }
 0x4cc   : > { %1638 = vmax.xlane.f32.xlu0 %v1637_v10 }
 0x4dd   : > { %2608 = vrot.lane.b32.xlu1 %v3478_v8, %s3053_s23 }
 0x4e0   : > { %2598 = vrot.lane.b32.xlu0 %v3478_v8, %s3052_s2 }
 0x4e2   : > { %2603 = vrot.lane.b32.xlu2 %v3466_v61, %s3053_s23 }
 0x50a   : > { %1284 = vadd.xlane.f32.xlu0 %v1283_v11 }
 0x512   : > { %1287 = vadd.xlane.f32.xlu0 %v1286_v12 }
 0x519   : > { %v1461_v13 = vpop.xlane.xlu2 %1460 }
 0x51a   : > { %v1463_v15 = vsub.f32 %v1453_v1, %v1461_v13 }
 0x51c   : > { %v1466_v18 = vmul.f32 1.442695, %v1463_v15 }
 0x537   : > { %v1458_v14 = vpop.xlane.xlu1 %1457 }
 0x538   : > { %v1462_v23 = vsub.f32 %v1421_v4, %v1458_v14 }
 0x53a   : > { %v1464_v17 = vmul.f32 1.442695, %v1462_v23 }
 0x53c   : > { %2643 = vpow2.f32 %v1464_v17 }
 0x53d   : > { %v1642_v19 = vpop.xlane.xlu2 %1641  ;;  %2645 = vpow2.f32 %v1466_v18 }
 0x53e   : > { %v1644_v20 = vsub.f32 %v1634_v6, %v1642_v19 }
 0x53f   : > { %v1639_v21 = vpop.xlane.xlu0 %1638 }
 0x540   : > { %v1647_v8 = vmul.f32 1.442695, %v1644_v20  ;;  %v1643_v25 = vsub.f32 %v1602_v9, %v1639_v21 }
 0x542   : > { %v2644_v61 = vpop.eup %2643  ;;  %2647 = vpow2.f32 %v1647_v8  ;;  %v1645_v27 = vmul.f32 1.442695, %v1643_v25 }
 0x543   : > { %2427 = vmatmul.msk.f32.vlgmr.msra.gmra.mxu1 %vm1110_vm4, %v2644_v61  ;;  %v1468_v28 = vsel %vm1110_vm4, %v2644_v61, 0.0  ;;  %v2646_v31 = vpop.eup %2645 }
 0x544   : > { %2649 = vpow2.f32 %v1645_v27  ;;  %1469 = vadd.xlane.f32.xlu1 %v1468_v28  ;;  %v1471_v26 = vsel %vm1110_vm4, %v2646_v31, 0.0 }
 0x545   : > { %v2604_v29 = vpop.permute.xlu2 %2603 }
 0x546   : > { %v2605_v30 = vunpack.i.l.bf16 %v2604_v29  ;;  %v2606_v37 = vunpack.i.h.bf16 %v2604_v29 }
 0x548   : > { %v2648_v34 = vpop.eup %2647  ;;  %1678 = vmatpush.msrb.mxu1 %v2605_v30 }
 0x549   : > { %v1652_v38 = vsel %vm1110_vm4, %v2648_v34, 0.0 }
 0x54a   : > { %v2650_v33 = vpop.eup %2649  ;;  %1653 = vadd.xlane.f32.xlu0 %v1652_v38  ;;  %1679 = vmatpush.msrb.mxu1 %v2606_v37 }
 0x54b   : > { %2435 = vmatmul.msk.f32.vlgmr.msrb.gmra.mxu1 %vm1110_vm4, %v2650_v33  ;;  %v1649_v41 = vsel %vm1110_vm4, %v2650_v33, 0.0 }
 0x54c   : > { %1650 = vadd.xlane.f32.xlu2 %v1649_v41  ;;  %1472 = vadd.xlane.f32.xlu1 %v1471_v26 }
 0x54f   : > { %v2609_v32 = vpop.permute.xlu1 %2608 }
 0x550   : > { %v2610_v46 = vunpack.i.l.bf16 %v2609_v32  ;;  %v2611_v47 = vunpack.i.h.bf16 %v2609_v32 }
 0x552   : > { %v2599_v42 = vpop.permute.xlu0 %2598 }
 0x553   : > { %v2600_v43 = vunpack.i.l.bf16 %v2599_v42  ;;  %v2601_v22 = vunpack.i.h.bf16 %v2599_v42 }
 0x554   : > { %1124 = vadd.xlane.f32.xlu2 %v1123_v35  ;;  %1127 = vadd.xlane.f32.xlu1 %v1126_v40 }
 0x555   : > { %1526 = vmatpush.msrb.mxu2 %v2600_v43 }
 0x557   : > { %1527 = vmatpush.msrb.mxu2 %v2601_v22 }
 0x558   : > { %2428 = vmatmul.msk.f32.vlgmr.msrb.gmra.mxu2 %vm1110_vm4, %v2646_v31 }
 0x559   : > { %1707 = vmatpush.msra.mxu2 %v2610_v46 }
 0x55b   : > { %1708 = vmatpush.msra.mxu2 %v2611_v47 }
 0x560   : > { %2436 = vmatmul.msk.f32.vlgmr.msra.gmra.mxu2 %vm1110_vm4, %v2648_v34 }
 0x57d   : > { %v1285_v48 = vpop.xlane.xlu0 %1284 }
 0x57e   : > { %2651 = vrcp.f32 %v1285_v48  ;;  %v1362_v39 = vand.u32 2147483648, %v1285_v48  ;;  %v1360_v52 = vand.u32 2147483647, %v1285_v48  ;;  %vm1356_vm6 = vweird.f32 %v1285_v48 }
 0x580   : > { %v1363_v55 = vor.u32 1.1754944e-38, %v1362_v39  ;;  %vm1361_vm8 = vcmp.eq.f32.partialorder %v1360_v52, 8.507059e+37 }
 0x584   : > { %v2652_v24 = vpop.eup %2651 }
 0x585   : > { %v1352_v49 = vmul.f32 %v2652_v24, %v1285_v48  ;;  %v1288_v36 = vpop.xlane.xlu0 %1287  ;;  %vm1357_vm5 = vweird.f32 %v2652_v24 }
 0x586   : > { %2653 = vrcp.f32 %v1288_v36  ;;  %vm1358_vm7 = vmor %vm1356_vm6, %vm1357_vm5  ;;  %v1377_v62 = vand.u32 2147483648, %v1288_v36  ;;  %v1375_v1 = vand.u32 2147483647, %v1288_v36  ;;  %vm1371_vm10 = vweird.f32 %v1288_v36 }
 0x587   : > { %v1353_v50 = vsub.f32 1.0, %v1352_v49 }
 0x588   : > { %v1378_v4 = vor.u32 1.1754944e-38, %v1377_v62  ;;  %vm1376_vm12 = vcmp.eq.f32.partialorder %v1375_v1, 8.507059e+37 }
 0x589   : > { %v1354_v51 = vmul.f32 %v2652_v24, %v1353_v50 }
 0x58b   : > { %v1355_v53 = vadd.f32 %v2652_v24, %v1354_v51 }
 0x58c   : > { %v2654_v54 = vpop.eup %2653 }
 0x58d   : > { %v1367_v56 = vmul.f32 %v2654_v54, %v1288_v36  ;;  %v1359_v57 = vsel %vm1358_vm7, %v2652_v24, %v1355_v53  ;;  %vm1372_vm9 = vweird.f32 %v2654_v54 }
 0x58e   : > { %v1364_v58 = vsel %vm1361_vm8, %v1363_v55, %v1359_v57  ;;  %vm1373_vm11 = vmor %vm1371_vm10, %vm1372_vm9 }
 0x58f   : > { %v1368_v59 = vsub.f32 1.0, %v1367_v56  ;;  %v1365_v60 = vmul.f32 %v1364_v58, %v3547_v3 }
 0x591   : > { %v1369_v63 = vmul.f32 %v2654_v54, %v1368_v59  ;;  %1383 = vrot.lane.b32.xlu0 %v1365_v60, %s3053_s23 }
 0x593   : > { %v1370_v2 = vadd.f32 %v2654_v54, %v1369_v63 }
 0x595   : > { %v1374_v5 = vsel %vm1373_vm11, %v2654_v54, %v1370_v2 }
 0x596   : > { %v1379_v6 = vsel %vm1376_vm12, %v1378_v4, %v1374_v5 }
 0x597   : > { %v1380_v7 = vmul.f32 %v1379_v6, %v3544_v0 }
 0x599   : > { %1385 = vrot.lane.b32.xlu0 %v1380_v7, %s3053_s23 }
 0x5b7   : > { %v1470_v9 = vpop.xlane.xlu1 %1469 }
 0x5b8   : > { %2655 = vrcp.f32 %v1470_v9  ;;  %v1543_v23 = vand.u32 2147483648, %v1470_v9  ;;  %v1541_v17 = vand.u32 2147483647, %v1470_v9  ;;  %vm1537_vm14 = vweird.f32 %v1470_v9 }
 0x5ba   : > { %v1544_v20 = vor.u32 1.1754944e-38, %v1543_v23  ;;  %vm1542_vm0 = vcmp.eq.f32.partialorder %v1541_v17, 8.507059e+37 }
 0x5bd   : > { %v3579_v14 = vpop.xlane.xlu0 %1653 }
 0x5be   : > { %v2656_v3 = vpop.eup %2655  ;;  %v1739_v17 = vand.u32 2147483648, %v3579_v14 }
 0x5bf   : > { %v1533_v10 = vmul.f32 %v2656_v3, %v1470_v9  ;;  %v1651_v11 = vpop.xlane.xlu2 %1650  ;;  %v3576_v12 = vpop.xlane.xlu1 %1472  ;;  %vm1538_vm13 = vweird.f32 %v2656_v3 }
 0x5c0   : > { %2657 = vrcp.f32 %v1651_v11  ;;  %v1500_v19 = vpop.f32.mrf.mxu1  ;;  %vm1539_vm15 = vmor %vm1537_vm14, %vm1538_vm13  ;;  %v1724_v34 = vand.u32 2147483648, %v1651_v11  ;;  %v1722_v33 = vand.u32 2147483647, %v1651_v11  ;;  %vm1718_vm2 = vweird.f32 %v1651_v11 }
 0x5c1   : > { %v1534_v13 = vsub.f32 1.0, %v1533_v10  ;;  %2659 = vrcp.f32 %v3576_v12  ;;  %v1558_v51 = vand.u32 2147483648, %v3576_v12  ;;  %vm1552_vm11 = vweird.f32 %v3576_v12 }
 0x5c2   : > { %2661 = vrcp.f32 %v3579_v14  ;;  %v1725_v40 = vor.u32 1.1754944e-38, %v1724_v34  ;;  %vm1723_vm5 = vcmp.eq.f32.partialorder %v1722_v33, 8.507059e+37  ;;  %v1556_v62 = vand.u32 2147483647, %v3576_v12  ;;  %v1763_v34 = vld [vmem:[#allocation14 + $0x38] sm:$0xff]  ;;  %v1760_v33 = vld [vmem:[#allocation14 + $0x20] sm:$0xff] }
 0x5c3   : > { %v1535_v15 = vmul.f32 %v2656_v3, %v1534_v13  ;;  %v1559_v9 = vor.u32 1.1754944e-38, %v1558_v51 }
 0x5c5   : > { %v1536_v0 = vadd.f32 %v2656_v3, %v1535_v15 }
 0x5c6   : > { %v2658_v18 = vpop.eup %2657 }
 0x5c7   : > { %v3582_v21 = vpop.eup %2659  ;;  %v1714_v8 = vmul.f32 %v2658_v18, %v1651_v11  ;;  %v1540_v25 = vsel %vm1539_vm15, %v2656_v3, %v1536_v0  ;;  %v1125_v61 = vpop.xlane.xlu2 %1124  ;;  %vm1719_vm1 = vweird.f32 %v2658_v18 }
 0x5c8   : > { %v1128_v27 = vpop.xlane.xlu1 %1127  ;;  %v1548_v28 = vmul.f32 %v3582_v21, %v3576_v12  ;;  %v1545_v29 = vsel %vm1542_vm0, %v1544_v20, %v1540_v25  ;;  %2663 = vrcp.f32 %v1125_v61  ;;  %v3586_v37 = vpop.eup %2661  ;;  %vm1720_vm4 = vmor %vm1718_vm2, %vm1719_vm1  ;;  %v1186_v39 = vand.u32 2147483648, %v1125_v61  ;;  %v1770_v25 = vld [vmem:[#allocation14 + $0x70] sm:$0xff] }
 0x5c9   : > { %v1715_v30 = vsub.f32 1.0, %v1714_v8  ;;  %v1546_v31 = vmul.f32 %v1545_v29, %v1500_v19  ;;  %2665 = vrcp.f32 %v1128_v27  ;;  %v1729_v35 = vmul.f32 %v3586_v37, %v3579_v14  ;;  %v1681_v46 = vpop.f32.mrf.mxu1  ;;  %v1771_v8 = vld [vmem:[#allocation14 + $0x78] sm:$0xff]  ;;  %v1766_v29 = vld [vmem:[#allocation14 + $0x50] sm:$0xff] }
 0x5ca   : > { %v1549_v41 = vsub.f32 1.0, %v1548_v28  ;;  %v1184_v53 = vand.u32 2147483647, %v1125_v61  ;;  %vm1180_vm7 = vweird.f32 %v1125_v61  ;;  %v1201_v55 = vand.u32 2147483648, %v1128_v27  ;;  %1776 = vmatpush.msra.mxu3 %v1771_v8  ;;  %v1767_v28 = vld [vmem:[#allocation14 + $0x58] sm:$0xff]  ;;  %v1862_v8 = vld [vmem:[#allocation15 + $0x48] sm:$0xff] }
 0x5cb   : > { %v1716_v38 = vmul.f32 %v2658_v18, %v1715_v30  ;;  %1564 = vrot.lane.b32.xlu2 %v1546_v31, %s3052_s2  ;;  %v1730_v50 = vsub.f32 1.0, %v1729_v35  ;;  %vm1553_vm8 = vweird.f32 %v3582_v21  ;;  %v1199_v59 = vand.u32 2147483647, %v1128_v27  ;;  %v1765_v30 = vld [vmem:[#allocation14 + $0x48] sm:$0xff]  ;;  %v1764_v31 = vld [vmem:[#allocation14 + $0x40] sm:$0xff] }
 0x5cc   : > { %v1550_v48 = vmul.f32 %v3582_v21, %v1549_v41  ;;  %v1187_v60 = vor.u32 1.1754944e-38, %v1186_v39  ;;  %vm1185_vm12 = vcmp.eq.f32.partialorder %v1184_v53, 8.507059e+37  ;;  %vm1195_vm13 = vweird.f32 %v1128_v27  ;;  %vm1554_vm14 = vmor %vm1552_vm11, %vm1553_vm8  ;;  %1777 = vmatpush.msra.mxu3 %v1770_v25  ;;  %v1757_v35 = vld [vmem:[#allocation14 + $0x8] sm:$0xff]  ;;  %v1859_v25 = vld [vmem:[#allocation15 + $0x30] sm:$0xff] }
 0x5cd   : > { %v1717_v26 = vadd.f32 %v2658_v18, %v1716_v38  ;;  %v1202_v4 = vor.u32 1.1754944e-38, %v1201_v55  ;;  %v1731_v6 = vmul.f32 %v3586_v37, %v1730_v50  ;;  %vm1200_vm0 = vcmp.eq.f32.partialorder %v1199_v59, 8.507059e+37  ;;  %v1761_v38 = vld [vmem:[#allocation14 + $0x28] sm:$0xff]  ;;  %v1884_v55 = vld [vmem:[#allocation15 + $0xf8] sm:$0xff] }
 0x5ce   : > { %v2664_v42 = vpop.eup %2663  ;;  %v1551_v56 = vadd.f32 %v3582_v21, %v1550_v48  ;;  %vm1557_vm1 = vcmp.eq.f32.partialorder %v1556_v62, 8.507059e+37  ;;  %vm1734_vm2 = vweird.f32 %v3586_v37  ;;  %vm1751_vm8 = vcmask 1048320   ;;  %v2617_v48 = vld [vmem:[%s3796_s11] ss:$0 sm:$0xff]  ;;  %1914 = vmatpush.msra.mxu1 %v1884_v55 }
 0x5cf   : > { %v1176_v43 = vmul.f32 %v2664_v42, %v1125_v61  ;;  %v1721_v32 = vsel %vm1720_vm4, %v2658_v18, %v1717_v26  ;;  %v2666_v22 = vpop.eup %2665  ;;  %vm1181_vm6 = vweird.f32 %v2664_v42  ;;  %v1732_v15 = vadd.f32 %v3586_v37, %v1731_v6  ;;  %v1769_v61 = vld [vmem:[#allocation14 + $0x68] sm:$0xff]  ;;  %v1759_v26 = vld [vmem:[#allocation14 + $0x18] sm:$0xff] }
 0x5d0   : > { %v1726_v47 = vsel %vm1723_vm5, %v1725_v40, %v1721_v32  ;;  %v1191_v49 = vmul.f32 %v2666_v22, %v1128_v27  ;;  %vm1196_vm9 = vweird.f32 %v2666_v22  ;;  %vm1182_vm10 = vmor %vm1180_vm7, %vm1181_vm6  ;;  %v1555_v5 = vsel %vm1554_vm14, %v3582_v21, %v1551_v56  ;;  %v1768_v27 = vld [vmem:[#allocation14 + $0x60] sm:$0xff]  ;;  %1778 = vmatpush.msra.mxu3 %v1769_v61  ;;  %v1880_v6 = vld [vmem:[#allocation15 + $0xd8] sm:$0xff] }
 0x5d1   : > { %v1177_v24 = vsub.f32 1.0, %v1176_v43  ;;  %v1727_v36 = vmul.f32 %v1726_v47, %v1681_v46  ;;  %vm1197_vm15 = vmor %vm1195_vm13, %vm1196_vm9  ;;  %v1560_v12 = vsel %vm1557_vm1, %v1559_v9, %v1555_v5  ;;  %vm1733_vm4 = vweird.f32 %v3579_v14  ;;  %v1756_v40 = vld [vmem:[#allocation14] sm:$0xff]  ;;  %v1879_v5 = vld [vmem:[#allocation15 + $0xd0] sm:$0xff] }
 0x5d2   : > { %v1192_v54 = vsub.f32 1.0, %v1191_v49  ;;  %vm1735_vm5 = vmor %vm1733_vm4, %vm1734_vm2  ;;  %v1740_v18 = vor.u32 1.1754944e-38, %v1739_v17  ;;  %vm1389_vm7 = vcmask 523520   ;;  %1779 = vmatpush.msra.mxu3 %v1768_v27  ;;  %v1881_v56 = vld [vmem:[#allocation15 + $0xe0] sm:$0xff]  ;;  %v1878_v9 = vld [vmem:[#allocation15 + $0xc8] sm:$0xff] }
 0x5d3   : > { %v1178_v52 = vmul.f32 %v2664_v42, %v1177_v24  ;;  %1745 = vrot.lane.b32.xlu1 %v1727_v36, %s3051_s26  ;;  %v1736_v0 = vsel %vm1735_vm5, %v3586_v37, %v1732_v15  ;;  %v1762_v37 = vld [vmem:[#allocation14 + $0x30] sm:$0xff]  ;;  %v1869_v15 = vld [vmem:[#allocation15 + $0x80] sm:$0xff]  ;;  %v1870_v17 = vld [vmem:[#allocation15 + $0x88] sm:$0xff] }
 0x5d4   : > { %v1193_v58 = vmul.f32 %v2666_v22, %v1192_v54  ;;  %1780 = vmatpush.msra.mxu3 %v1767_v28  ;;  %v2679_v36 = vld [vmem:[%s3335_s22] sm:$0xff] }
 0x5d5   : > { %v1179_v57 = vadd.f32 %v2664_v42, %v1178_v52  ;;  %v2680_v52 = vld [vmem:[%s3335_s22 + $0x8] sm:$0xff] }
 0x5d6   : > { %v1194_v1 = vadd.f32 %v2666_v22, %v1193_v58  ;;  %1781 = vmatpush.msra.mxu3 %v1766_v29  ;;  %v1883_v54 = vld [vmem:[#allocation15 + $0xf0] sm:$0xff]  ;;  %v1860_v61 = vld [vmem:[#allocation15 + $0x38] sm:$0xff]  ;;  %v1857_v27 = vld [vmem:[#allocation15 + $0x20] sm:$0xff] }
 0x5d7   : > { %v1183_v63 = vsel %vm1182_vm10, %v2664_v42, %v1179_v57  ;;  %v1758_v42 = vld [vmem:[#allocation14 + $0x10] sm:$0xff]  ;;  %1891 = vmatpush.msra.mxu0 %v1883_v54  ;;  %v1882_v57 = vld [vmem:[#allocation15 + $0xe8] sm:$0xff]  ;;  %v1856_v29 = vld [vmem:[#allocation15 + $0x18] sm:$0xff] }
 0x5d8   : > { %v1188_v2 = vsel %vm1185_vm12, %v1187_v60, %v1183_v63  ;;  %v1198_v7 = vsel %vm1197_vm15, %v2666_v22, %v1194_v1  ;;  %1782 = vmatpush.msra.mxu3 %v1765_v30  ;;  %1915 = vmatpush.msra.mxu1 %v1882_v57  ;;  %v1855_v28 = vld [vmem:[#allocation15 + $0x10] sm:$0xff] }
 0x5d9   : > { %v1189_v3 = vmul.f32 %v1188_v2, %v3523_v44  ;;  %v1203_v10 = vsel %vm1200_vm0, %v1202_v4, %v1198_v7  ;;  %v1737_v44 = vand.u32 2147483647, %v3579_v14  ;;  %1892 = vmatpush.msra.mxu0 %v1881_v56  ;;  %v1877_v7 = vld [vmem:[#allocation15 + $0xc0] sm:$0xff] }
 0x5da   : > { %v1204_v13 = vmul.f32 %v1203_v10, %v3525_v45  ;;  %1783 = vmatpush.msra.mxu3 %v1764_v31  ;;  %1916 = vmatpush.msra.mxu1 %v1880_v6  ;;  %v1876_v10 = vld [vmem:[#allocation15 + $0xb8] sm:$0xff]  ;;  %v1853_v31 = vld [vmem:[#allocation15] sm:$0xff]  ;;  %v2143_v6 = vld [vmem:[#allocation17 + $0xf0] sm:$0xff] }
 0x5db   : > { %v1529_v11 = vpop.f32.mrf.mxu2  ;;  %1205 = vst.msk [vmem:[#allocation2] sm:$0xff] %vm1051_vm3, %v1189_v3  ;;  %vm1738_vm6 = vcmp.eq.f32.partialorder %v1737_v44, 8.507059e+37  ;;  %1893 = vmatpush.msra.mxu0 %v1879_v5  ;;  %v1875_v3 = vld [vmem:[#allocation15 + $0xb0] sm:$0xff] }
 0x5dc   : > { %v1561_v23 = vmul.f32 %v1560_v12, %v1529_v11  ;;  %1206 = vst.msk [vmem:[#allocation2 + $0x8] sm:$0xff] %vm1051_vm3, %v1204_v13  ;;  %v1741_v19 = vsel %vm1738_vm6, %v1740_v18, %v1736_v0  ;;  %1784 = vmatpush.msra.mxu3 %v1763_v34  ;;  %vm1570_vm3 = vcmask 785920   ;;  %1917 = vmatpush.msra.mxu1 %v1878_v9  ;;  %v1873_v11 = vld [vmem:[#allocation15 + $0xa0] sm:$0xff]  ;;  %v1874_v12 = vld [vmem:[#allocation15 + $0xa8] sm:$0xff]  ;;  %v1871_v13 = vld [vmem:[#allocation15 + $0x90] sm:$0xff] }
 0x5dd   : > { %1894 = vmatpush.msra.mxu0 %v1877_v7  ;;  %v1867_v44 = vld [vmem:[#allocation15 + $0x70] sm:$0xff]  ;;  %v1868_v0 = vld [vmem:[#allocation15 + $0x78] sm:$0xff]  ;;  %v1865_v18 = vld [vmem:[#allocation15 + $0x60] sm:$0xff] }
 0x5de   : > { %1566 = vrot.lane.b32.xlu2 %v1561_v23, %s3052_s2  ;;  %1785 = vmatpush.msra.mxu3 %v1762_v37  ;;  %v1872_v23 = vld [vmem:[#allocation15 + $0x98] sm:$0xff]  ;;  %v1854_v34 = vld [vmem:[#allocation15 + $0x8] sm:$0xff]  ;;  %v2127_v5 = vld [vmem:[#allocation17 + $0x70] sm:$0xff]  ;;  %s3860_s2 = sld [smem:[#allocation44_spill]] }
 0x5df   : > { %1895 = vmatpush.msra.mxu0 %v1875_v3  ;;  %1918 = vmatpush.msra.mxu1 %v1876_v10  ;;  %v2142_v7 = vld [vmem:[#allocation17 + $0xe8] sm:$0xff] }
 0x5e0   : > { %1786 = vmatpush.msra.mxu3 %v1761_v38 }
 0x5e1   : > { %1896 = vmatpush.msra.mxu0 %v1873_v11  ;;  %1919 = vmatpush.msra.mxu1 %v1874_v12  ;;  %v2125_v12 = vld [vmem:[#allocation17 + $0x60] sm:$0xff] }
 0x5e2   : > { %1787 = vmatpush.msra.mxu3 %v1760_v33 }
 0x5e3   : > { %v1710_v45 = vpop.f32.mrf.mxu2  ;;  %1897 = vmatpush.msra.mxu0 %v1871_v13  ;;  %1920 = vmatpush.msra.mxu1 %v1872_v23  ;;  %v2141_v13 = vld [vmem:[#allocation17 + $0xe0] sm:$0xff] }
 0x5e4   : > { %v1742_v20 = vmul.f32 %v1741_v19, %v1710_v45  ;;  %1788 = vmatpush.msra.mxu3 %v1759_v26  ;;  %v1866_v45 = vld [vmem:[#allocation15 + $0x68] sm:$0xff]  ;;  %v1863_v19 = vld [vmem:[#allocation15 + $0x50] sm:$0xff]  ;;  %s2211_s4 = scalar_lea.hbm %s3860_s2, %s2449_s3  ;;  %s2971_s1 = scalar_lea.hbm %s3860_s2, 32 }
 0x5e5   : > { %1898 = vmatpush.msra.mxu0 %v1869_v15  ;;  %1921 = vmatpush.msra.mxu1 %v1870_v17  ;;  %v2124_v17 = vld [vmem:[#allocation17 + $0x58] sm:$0xff]  ;;  %s2214_s22 = sshll.u32 %s2211_s4, 4  ;;  %s2215_s22 = int_to_ptr.hbm [resolvable:$true] %s2214_s22 }
 0x5e6   : > { %1747 = vrot.lane.b32.xlu0 %v1742_v20, %s3051_s26  ;;  %1789 = vmatpush.msra.mxu3 %v1758_v42  ;;  %v1864_v20 = vld [vmem:[#allocation15 + $0x58] sm:$0xff]  ;;  %s3859_s26 = sld [smem:[#allocation43_spill]]  ;;  %s2965_s27 = sshra.s32 %s2215_s22, 4  ;;  %s2966_s27 = int_to_ptr.hbm [resolvable:$true] %s2965_s27 }
 0x5e7   : > { %1899 = vmatpush.msra.mxu0 %v1867_v44  ;;  %1922 = vmatpush.msra.mxu1 %v1868_v0  ;;  %v2140_v44 = vld [vmem:[#allocation17 + $0xd8] sm:$0xff]  ;;  %s2967_s20 = scalar_lea.hbm %s2966_s27, 16  ;;  %p2972_p7 = scmp.lt.s32.totalorder %s2966_s27, %s3860_s2 }
 0x5e8   : > { %1790 = vmatpush.msra.mxu3 %v1757_v35  ;;  %p2968_p1 = scmp.ne.s32.totalorder %s2966_s27, %s2967_s20  ;;  %p2973_p9 = scmp.lt.s32.totalorder %s2971_s1, %s2967_s20 }
 0x5e9   : > { %1900 = vmatpush.msra.mxu0 %v1865_v18  ;;  %1923 = vmatpush.msra.mxu1 %v1866_v45  ;;  %v2123_v45 = vld [vmem:[#allocation17 + $0x50] sm:$0xff] }
 0x5ea   : > { %1791 = vmatpush.msra.mxu3 %v1756_v40  ;;  %p2969_p3 = pnand %p2968_p1, %p3266_p0  ;;  %p2974_p4 = por %p2973_p9, %p2972_p7 }
 0x5eb   : > { %1901 = vmatpush.msra.mxu0 %v1863_v19  ;;  %1924 = vmatpush.msra.mxu1 %v1864_v20  ;;  %v2139_v19 = vld [vmem:[#allocation17 + $0xd0] sm:$0xff] }
 0x5ec   : > { %p2970_p13 = pneg %p2969_p3 }
 0x5ed   : > { %1925 = vmatpush.msra.mxu1 %v1862_v8  ;;  %v2122_v8 = vld [vmem:[#allocation17 + $0x48] sm:$0xff] }
 0x5ee   : > { %p2975_p8 = pnand %p2974_p4, %p2970_p13 }
 0x5ef   : > { %1926 = vmatpush.msra.mxu1 %v1860_v61 }
 0x603   : > { %v1384_v21 = vpop.permute.xlu0 %1383 }
 0x604   : > { %1390 = vst.msk [vmem:[#allocation2] sm:$0xff] %vm1389_vm7, %v1384_v21  ;;  %v1861_v21 = vld [vmem:[#allocation15 + $0x40] sm:$0xff] }
 0x605   : > { %1902 = vmatpush.msra.mxu0 %v1861_v21 }
 0x607   : > { %1903 = vmatpush.msra.mxu0 %v1859_v25  ;;  %v2138_v25 = vld [vmem:[#allocation17 + $0xc8] sm:$0xff] }
 0x609   : > { %1904 = vmatpush.msra.mxu0 %v1857_v27 }
 0x60b   : > { %v1386_v14 = vpop.permute.xlu0 %1385  ;;  %1905 = vmatpush.msra.mxu0 %v1855_v28 }
 0x60c   : > { %1391 = vst.msk [vmem:[#allocation2 + $0x8] sm:$0xff] %vm1389_vm7, %v1386_v14  ;;  %v1858_v14 = vld [vmem:[#allocation15 + $0x28] sm:$0xff] }
 0x60d   : > { %1927 = vmatpush.msra.mxu1 %v1858_v14  ;;  %1906 = vmatpush.msra.mxu0 %v1853_v31 }
 0x60f   : > { %1928 = vmatpush.msra.mxu1 %v1856_v29  ;;  %v2121_v29 = vld [vmem:[#allocation17 + $0x40] sm:$0xff] }
 0x611   : > { %1929 = vmatpush.msra.mxu1 %v1854_v34 }
 0x625   : > { %v1565_v41 = vpop.permute.xlu2 %1564 }
 0x626   : > { %1571 = vst.msk [vmem:[#allocation2] sm:$0xff] %vm1570_vm3, %v1565_v41 }
 0x638   : > { %v1567_v43 = vpop.permute.xlu2 %1566 }
 0x639   : > { %1572 = vst.msk [vmem:[#allocation2 + $0x8] sm:$0xff] %vm1570_vm3, %v1567_v43 }
 0x645   : > { %v1746_v32 = vpop.permute.xlu1 %1745 }
 0x646   : > { %1752 = vst.msk [vmem:[#allocation2] sm:$0xff] %vm1751_vm8, %v1746_v32 }
 0x64d   : > { %v1754_v22 = vld [vmem:[#allocation2] sm:$0xff] }
 0x64e   : > { %1792 = vmatmul.f32.vlgmr.msra.gmra.mxu3 %v1754_v22  ;;  %v2618_v22 = vld [vmem:[%s3797_s12] ss:$0 sm:$0xff] }
 0x658   : > { %v1748_v46 = vpop.permute.xlu0 %1747 }
 0x659   : > { %1753 = vst.msk [vmem:[#allocation2 + $0x8] sm:$0xff] %vm1751_vm8, %v1748_v46 }
 0x660   : > { %v1755_v47 = vld [vmem:[#allocation2 + $0x8] sm:$0xff] }
 0x661   : > { %1795 = vmatmul.f32.gmra.mxu3 %v1755_v47 }
 0x6d1   : > { %v1793_v24 = vpop.f32.mrf.mxu3 }
 0x6d2   : > { %v1794_v49 = vadd.f32 %v2617_v48, %v1793_v24  ;;  %v2619_v24 = vld [vmem:[%s3798_s13] ss:$0 sm:$0xff] }
 0x6d4   : > { %v3616_v50 = vadd.f32 %v2679_v36, %v1794_v49 }
 0x6d6   : > { %1803 = vadd.xlane.f32.xlu1 %v3616_v50 }
 0x6e4   : > { %v1796_v39 = vpop.f32.mrf.mxu3 }
 0x6e5   : > { %v1797_v51 = vadd.f32 %v2617_v48, %v1796_v39 }
 0x6e7   : > { %v3620_v53 = vadd.f32 %v2680_v52, %v1797_v51 }
 0x6e9   : > { %1805 = vadd.xlane.f32.xlu2 %v3620_v53 }
 0x749   : > { %v1804_v58 = vpop.xlane.xlu1 %1803 }
 0x74a   : > { %v1807_v59 = vmul.f32 %v1804_v58, %v3365_v16 }
 0x74c   : > { %v3625_v60 = vsub.f32 %v3616_v50, %v1807_v59 }
 0x74e   : > { %v1811_v62 = vmul.f32 %v3625_v60, %v3625_v60 }
 0x750   : > { %1813 = vadd.xlane.f32.xlu0 %v1811_v62  ;;  %v2128_v62 = vld [vmem:[#allocation17 + $0x78] sm:$0xff] }
 0x751   : > { %2149 = vmatpush.msrb.mxu2 %v2128_v62 }
 0x753   : > { %2150 = vmatpush.msrb.mxu2 %v2127_v5 }
 0x75c   : > { %v1806_v63 = vpop.xlane.xlu2 %1805 }
 0x75d   : > { %v1808_v1 = vmul.f32 %v1806_v63, %v3365_v16  ;;  %v2144_v63 = vld [vmem:[#allocation17 + $0xf8] sm:$0xff] }
 0x75e   : > { %2172 = vmatpush.msrb.mxu3 %v2144_v63 }
 0x75f   : > { %v3631_v2 = vsub.f32 %v3620_v53, %v1808_v1 }
 0x760   : > { %2173 = vmatpush.msrb.mxu3 %v2143_v6  ;;  %v2116_v6 = vld [vmem:[#allocation17 + $0x18] sm:$0xff] }
 0x761   : > { %v1812_v4 = vmul.f32 %v3631_v2, %v3631_v2 }
 0x762   : > { %2174 = vmatpush.msrb.mxu3 %v2142_v7 }
 0x763   : > { %1815 = vadd.xlane.f32.xlu2 %v1812_v4 }
 0x764   : > { %2175 = vmatpush.msrb.mxu3 %v2141_v13 }
 0x766   : > { %2176 = vmatpush.msrb.mxu3 %v2140_v44  ;;  %v2130_v44 = vld [vmem:[#allocation17 + $0x88] sm:$0xff] }
 0x768   : > { %2177 = vmatpush.msrb.mxu3 %v2139_v19 }
 0x76a   : > { %2178 = vmatpush.msrb.mxu3 %v2138_v25  ;;  %v2129_v25 = vld [vmem:[#allocation17 + $0x80] sm:$0xff] }
 0x7c3   : > { %v1814_v30 = vpop.xlane.xlu0 %1813 }
 0x7c4   : > { %v1817_v37 = vmul.f32 %v1814_v30, %v3365_v16  ;;  %v2137_v30 = vld [vmem:[#allocation17 + $0xc0] sm:$0xff] }
 0x7c5   : > { %2179 = vmatpush.msrb.mxu3 %v2137_v30 }
 0x7c6   : > { %v1819_v38 = vadd.f32 1e-05, %v1817_v37 }
 0x7c8   : > { %2667 = vrsqrt.f32 %v1819_v38  ;;  %vm1827_vm10 = vweird.f32 %v1819_v38 }
 0x7ce   : > { %v2668_v33 = vpop.eup %2667 }
 0x7cf   : > { %v1822_v41 = vmul.f32 %v2668_v33, %v1819_v38  ;;  %vm1828_vm9 = vweird.f32 %v2668_v33 }
 0x7d0   : > { %vm1829_vm11 = vmor %vm1827_vm10, %vm1828_vm9 }
 0x7d1   : > { %v1823_v26 = vmul.f32 %v2668_v33, %v1822_v41  ;;  %v2136_v41 = vld [vmem:[#allocation17 + $0xb8] sm:$0xff] }
 0x7d2   : > { %2180 = vmatpush.msrb.mxu3 %v2136_v41 }
 0x7d3   : > { %v1824_v42 = vmul.f32 0.5, %v1823_v26 }
 0x7d5   : > { %v1825_v35 = vsub.f32 1.5, %v1824_v42 }
 0x7d6   : > { %v1816_v40 = vpop.xlane.xlu2 %1815 }
 0x7d7   : > { %v1826_v43 = vmul.f32 %v2668_v33, %v1825_v35  ;;  %v1818_v32 = vmul.f32 %v1816_v40, %v3365_v16  ;;  %v2119_v40 = vld [vmem:[#allocation17 + $0x30] sm:$0xff] }
 0x7d9   : > { %v1830_v46 = vsel %vm1829_vm11, %v2668_v33, %v1826_v43  ;;  %v1820_v47 = vadd.f32 1e-05, %v1818_v32  ;;  %v2120_v33 = vld [vmem:[#allocation17 + $0x38] sm:$0xff]  ;;  %v2135_v43 = vld [vmem:[#allocation17 + $0xb0] sm:$0xff] }
 0x7da   : > { %v1841_v48 = vmul.f32 %v1830_v46, %v3625_v60  ;;  %v3648_v60 = vld [vmem:[%s3858_s18] sm:$0x3]  ;;  %2181 = vmatpush.msrb.mxu3 %v2135_v43 }
 0x7db   : > { %2669 = vrsqrt.f32 %v1820_v47  ;;  %vm1837_vm13 = vweird.f32 %v1820_v47  ;;  %v1887_v1 = vperm.slane %v3648_v60, 0  ;;  %v1888_v4 = vperm.slane %v3648_v60, 1 }
 0x7dc   : > { %v1846_v49 = vmul.f32 %v2618_v22, %v1841_v48 }
 0x7de   : > { %v1851_v36 = vadd.f32 %v2619_v24, %v1846_v49  ;;  %v2134_v49 = vld [vmem:[#allocation17 + $0xa8] sm:$0xff] }
 0x7df   : > { %2182 = vmatpush.msrb.mxu3 %v2134_v49 }
 0x7e0   : > { %1907 = vmatmul.f32.vlgmr.msra.gmra.mxu0 %v1851_v36  ;;  %1930 = vmatmul.f32.vlgmr.msra.gmra.mxu1 %v1851_v36 }
 0x7e1   : > { %v2670_v39 = vpop.eup %2669 }
 0x7e2   : > { %v1832_v16 = vmul.f32 %v2670_v39, %v1820_v47  ;;  %vm1838_vm12 = vweird.f32 %v2670_v39 }
 0x7e3   : > { %vm1839_vm14 = vmor %vm1837_vm13, %vm1838_vm12 }
 0x7e4   : > { %v1833_v51 = vmul.f32 %v2670_v39, %v1832_v16 }
 0x7e6   : > { %v1834_v52 = vmul.f32 0.5, %v1833_v51  ;;  %v2117_v51 = vld [vmem:[#allocation17 + $0x20] sm:$0xff] }
 0x7e8   : > { %v1835_v54 = vsub.f32 1.5, %v1834_v52  ;;  %v2133_v52 = vld [vmem:[#allocation17 + $0xa0] sm:$0xff] }
 0x7e9   : > { %2183 = vmatpush.msrb.mxu3 %v2133_v52 }
 0x7ea   : > { %v1836_v55 = vmul.f32 %v2670_v39, %v1835_v54 }
 0x7ec   : > { %v1840_v56 = vsel %vm1839_vm14, %v2670_v39, %v1836_v55 }
 0x7ed   : > { %v1842_v57 = vmul.f32 %v1840_v56, %v3631_v2  ;;  %v2126_v2 = vld [vmem:[#allocation17 + $0x68] sm:$0xff] }
 0x7ee   : > { %2151 = vmatpush.msrb.mxu2 %v2126_v2  ;;  %v2132_v2 = vld [vmem:[#allocation17 + $0x98] sm:$0xff] }
 0x7ef   : > { %v1847_v58 = vmul.f32 %v2618_v22, %v1842_v57  ;;  %2184 = vmatpush.msrb.mxu3 %v2132_v2 }
 0x7f0   : > { %2152 = vmatpush.msrb.mxu2 %v2125_v12  ;;  %v2131_v12 = vld [vmem:[#allocation17 + $0x90] sm:$0xff] }
 0x7f1   : > { %v1852_v59 = vadd.f32 %v2619_v24, %v1847_v58  ;;  %v2118_v24 = vld [vmem:[#allocation17 + $0x28] sm:$0xff]  ;;  %2185 = vmatpush.msrb.mxu3 %v2131_v12 }
 0x7f2   : > { %2153 = vmatpush.msrb.mxu2 %v2124_v17 }
 0x7f3   : > { %1910 = vmatmul.f32.gmra.mxu0 %v1852_v59  ;;  %1933 = vmatmul.f32.gmra.mxu1 %v1852_v59 }
 0x7f4   : > { %2154 = vmatpush.msrb.mxu2 %v2123_v45  ;;  %2186 = vmatpush.msrb.mxu3 %v2130_v44 }
 0x7f6   : > { %2155 = vmatpush.msrb.mxu2 %v2122_v8  ;;  %v2113_v8 = vld [vmem:[#allocation17] sm:$0xff]  ;;  %2187 = vmatpush.msrb.mxu3 %v2129_v25 }
 0x7f8   : > { %2156 = vmatpush.msrb.mxu2 %v2121_v29 }
 0x7fa   : > { %2157 = vmatpush.msrb.mxu2 %v2120_v33 }
 0x7fc   : > { %2158 = vmatpush.msrb.mxu2 %v2119_v40 }
 0x7fe   : > { %2159 = vmatpush.msrb.mxu2 %v2118_v24 }
 0x800   : > { %2160 = vmatpush.msrb.mxu2 %v2117_v51 }
 0x802   : > { %2161 = vmatpush.msrb.mxu2 %v2116_v6 }
 0x85d   : > { %v1908_v9 = vpop.f32.mrf.mxu0  ;;  %v1931_v3 = vpop.f32.mrf.mxu1 }
 0x85e   : > { %v3654_v10 = vadd.f32 %v1908_v9, %v1887_v1  ;;  %v3658_v11 = vadd.f32 %v1931_v3, %v1888_v4  ;;  %v2115_v3 = vld [vmem:[#allocation17 + $0x10] sm:$0xff] }
 0x85f   : > { %2162 = vmatpush.msrb.mxu2 %v2115_v3 }
 0x860   : > { %v3661_v23 = vmul.f32 0.70710677, %v3654_v10  ;;  %v3664_v15 = vmul.f32 0.70710677, %v3658_v11 }
 0x862   : > { %v1945_v0 = vmul.f32 %v3661_v23, %v3661_v23  ;;  %v1985_v18 = vmul.f32 %v3664_v15, %v3664_v15 }
 0x864   : > { %v3670_v20 = vmin.f32 %v1945_v0, 16.0  ;;  %v3672_v21 = vmin.f32 %v1985_v18, 16.0 }
 0x866   : > { %v1947_v61 = vmul.f32 2.1237322e-06, %v3670_v20  ;;  %v1958_v27 = vmul.f32 3.8918573e-05, %v3670_v20  ;;  %v1987_v14 = vmul.f32 2.1237322e-06, %v3672_v21 }
 0x867   : > { %v1998_v28 = vmul.f32 3.8918573e-05, %v3672_v21 }
 0x868   : > { %v1948_v31 = vadd.f32 0.00028619796, %v1947_v61  ;;  %v1959_v34 = vadd.f32 0.001143296, %v1958_v27  ;;  %v1988_v37 = vadd.f32 0.00028619796, %v1987_v14 }
 0x869   : > { %v1999_v38 = vadd.f32 0.001143296, %v1998_v28 }
 0x86a   : > { %v1949_v26 = vmul.f32 %v1948_v31, %v3670_v20  ;;  %v1960_v42 = vmul.f32 %v1959_v34, %v3670_v20  ;;  %v1989_v35 = vmul.f32 %v1988_v37, %v3672_v21 }
 0x86b   : > { %v2000_v32 = vmul.f32 %v1999_v38, %v3672_v21 }
 0x86c   : > { %v1950_v22 = vadd.f32 0.0036580483, %v1949_v26  ;;  %v1961_v46 = vadd.f32 0.014752088, %v1960_v42  ;;  %v1990_v47 = vadd.f32 0.0036580483, %v1989_v35 }
 0x86d   : > { %v2001_v48 = vadd.f32 0.014752088, %v2000_v32 }
 0x86e   : > { %v1951_v36 = vmul.f32 %v1950_v22, %v3670_v20  ;;  %v1962_v39 = vmul.f32 %v1961_v46, %v3670_v20  ;;  %v1991_v16 = vmul.f32 %v1990_v47, %v3672_v21 }
 0x86f   : > { %v2002_v54 = vmul.f32 %v2001_v48, %v3672_v21 }
 0x870   : > { %v1952_v55 = vadd.f32 0.05243302, %v1951_v36  ;;  %v1963_v56 = vadd.f32 0.112945676, %v1962_v39  ;;  %v1992_v57 = vadd.f32 0.05243302, %v1991_v16  ;;  %v1911_v58 = vpop.f32.mrf.mxu0  ;;  %v1934_v59 = vpop.f32.mrf.mxu1 }
 0x871   : > { %v2003_v62 = vadd.f32 0.112945676, %v2002_v54  ;;  %v3688_v63 = vadd.f32 %v1911_v58, %v1887_v1  ;;  %v3692_v5 = vadd.f32 %v1934_v59, %v1888_v4  ;;  %v2114_v1 = vld [vmem:[#allocation17 + $0x8] sm:$0xff] }
 0x872   : > { %v1953_v7 = vmul.f32 %v1952_v55, %v3670_v20  ;;  %v1964_v9 = vmul.f32 %v1963_v56, %v3670_v20  ;;  %v1993_v0 = vmul.f32 %v1992_v57, %v3672_v21  ;;  %2163 = vmatpush.msrb.mxu2 %v2114_v1 }
 0x873   : > { %v2004_v13 = vmul.f32 %v2003_v62, %v3672_v21  ;;  %v3698_v17 = vmul.f32 0.70710677, %v3688_v63  ;;  %v3704_v19 = vmul.f32 0.70710677, %v3692_v5 }
 0x874   : > { %v1954_v60 = vadd.f32 0.18741608, %v1953_v7  ;;  %v1965_v4 = vadd.f32 0.4994258, %v1964_v9  ;;  %v1994_v31 = vadd.f32 0.18741608, %v1993_v0  ;;  %2164 = vmatpush.msrb.mxu2 %v2113_v8 }
 0x875   : > { %v2005_v18 = vadd.f32 0.4994258, %v2004_v13  ;;  %v2025_v45 = vmul.f32 %v3698_v17, %v3698_v17  ;;  %v2065_v28 = vmul.f32 %v3704_v19, %v3704_v19 }
 0x876   : > { %v1966_v61 = vmul.f32 %v1965_v4, %v3670_v20  ;;  %v1955_v29 = vmul.f32 %v1954_v60, %v3670_v20  ;;  %v1995_v26 = vmul.f32 %v1994_v31, %v3672_v21 }
 0x877   : > { %v2006_v27 = vmul.f32 %v2005_v18, %v3672_v21  ;;  %v3708_v14 = vmin.f32 %v2025_v45, 16.0  ;;  %v3714_v38 = vmin.f32 %v2065_v28, 16.0 }
 0x878   : > { %v1967_v30 = vadd.f32 1.0, %v1966_v61  ;;  %v1956_v41 = vadd.f32 1.1283791, %v1955_v29  ;;  %v1996_v48 = vadd.f32 1.1283791, %v1995_v26 }
 0x879   : > { %v2007_v34 = vadd.f32 1.0, %v2006_v27  ;;  %v2027_v37 = vmul.f32 2.1237322e-06, %v3708_v14  ;;  %v2038_v33 = vmul.f32 3.8918573e-05, %v3708_v14 }
 0x87a   : > { %2671 = vrcp.f32 %v1967_v30  ;;  %v2067_v35 = vmul.f32 2.1237322e-06, %v3714_v38  ;;  %v2078_v43 = vmul.f32 3.8918573e-05, %v3714_v38  ;;  %v1957_v47 = vmul.f32 %v1956_v41, %v3661_v23 }
 0x87b   : > { %2673 = vrcp.f32 %v2007_v34  ;;  %v2028_v42 = vadd.f32 0.00028619796, %v2027_v37  ;;  %v2039_v20 = vadd.f32 0.001143296, %v2038_v33  ;;  %vm1973_vm15 = vweird.f32 %v1967_v30 }
 0x87c   : > { %v2068_v32 = vadd.f32 0.00028619796, %v2067_v35  ;;  %v2079_v24 = vadd.f32 0.001143296, %v2078_v43  ;;  %v1977_v16 = vand.u32 2147483647, %v1967_v30  ;;  %v1997_v23 = vmul.f32 %v1996_v48, %v3664_v15 }
 0x87d   : > { %v2029_v40 = vmul.f32 %v2028_v42, %v3708_v14  ;;  %v2040_v22 = vmul.f32 %v2039_v20, %v3708_v14  ;;  %v1979_v56 = vand.u32 2147483648, %v1967_v30  ;;  %v2017_v57 = vand.u32 2147483647, %v2007_v34 }
 0x87e   : > { %v2069_v21 = vmul.f32 %v2068_v32, %v3714_v38  ;;  %v2080_v54 = vmul.f32 %v2079_v24, %v3714_v38  ;;  %v2019_v7 = vand.u32 2147483648, %v2007_v34  ;;  %vm1978_vm2 = vcmp.eq.f32.partialorder %v1977_v16, 8.507059e+37 }
 0x87f   : > { %v2041_v39 = vadd.f32 0.014752088, %v2040_v22  ;;  %v2030_v52 = vadd.f32 0.0036580483, %v2029_v40  ;;  %vm2013_vm4 = vweird.f32 %v2007_v34  ;;  %v1980_v15 = vor.u32 1.1754944e-38, %v1979_v56 }
 0x880   : > { %v2672_v46 = vpop.eup %2671  ;;  %v2070_v62 = vadd.f32 0.0036580483, %v2069_v21  ;;  %v2081_v6 = vadd.f32 0.014752088, %v2080_v54  ;;  %vm2018_vm7 = vcmp.eq.f32.partialorder %v2017_v57, 8.507059e+37  ;;  %v2020_v45 = vor.u32 1.1754944e-38, %v2019_v7 }
 0x881   : > { %v2674_v49 = vpop.eup %2673  ;;  %v1969_v36 = vmul.f32 %v2672_v46, %v1967_v30  ;;  %v2042_v58 = vmul.f32 %v2041_v39, %v3708_v14  ;;  %vm1974_vm0 = vweird.f32 %v2672_v46  ;;  %v2031_v12 = vmul.f32 %v2030_v52, %v3708_v14 }
 0x882   : > { %v2009_v51 = vmul.f32 %v2674_v49, %v2007_v34  ;;  %vm2014_vm1 = vweird.f32 %v2674_v49  ;;  %v2082_v13 = vmul.f32 %v2081_v6, %v3714_v38  ;;  %vm1975_vm5 = vmor %vm1973_vm15, %vm1974_vm0  ;;  %v2071_v4 = vmul.f32 %v2070_v62, %v3714_v38 }
 0x883   : > { %v1970_v55 = vsub.f32 1.0, %v1969_v36  ;;  %v2043_v9 = vadd.f32 0.112945676, %v2042_v58  ;;  %vm2015_vm6 = vmor %vm2013_vm4, %vm2014_vm1  ;;  %v2032_v27 = vadd.f32 0.05243302, %v2031_v12  ;;  %v1937_v40 = vmul.f32 0.5, %v3654_v10 }
 0x884   : > { %v2010_v59 = vsub.f32 1.0, %v2009_v51  ;;  %v2083_v0 = vadd.f32 0.112945676, %v2082_v13  ;;  %v2072_v37 = vadd.f32 0.05243302, %v2071_v4  ;;  %v1938_v32 = vmul.f32 0.5, %v3658_v11 }
 0x885   : > { %v1971_v2 = vmul.f32 %v2672_v46, %v1970_v55  ;;  %v2044_v44 = vmul.f32 %v2043_v9, %v3708_v14  ;;  %v2033_v35 = vmul.f32 %v2032_v27, %v3708_v14 }
 0x886   : > { %v2011_v3 = vmul.f32 %v2674_v49, %v2010_v59  ;;  %v2084_v28 = vmul.f32 %v2083_v0, %v3714_v38  ;;  %v1939_v0 = vmul.f32 0.5, %v3688_v63 }
 0x887   : > { %v1972_v1 = vadd.f32 %v2672_v46, %v1971_v2  ;;  %v2045_v8 = vadd.f32 0.4994258, %v2044_v44 }
 0x888   : > { %v2012_v60 = vadd.f32 %v2674_v49, %v2011_v3  ;;  %v2085_v33 = vadd.f32 0.4994258, %v2084_v28 }
 0x889   : > { %v1976_v18 = vsel %vm1975_vm5, %v2672_v46, %v1972_v1  ;;  %v2046_v30 = vmul.f32 %v2045_v8, %v3708_v14  ;;  %v2073_v46 = vmul.f32 %v2072_v37, %v3714_v38  ;;  %v1940_v8 = vmul.f32 0.5, %v3692_v5 }
 0x88a   : > { %v1981_v25 = vsel %vm1978_vm2, %v1980_v15, %v1976_v18  ;;  %v2016_v61 = vsel %vm2015_vm6, %v2674_v49, %v2012_v60  ;;  %v2086_v20 = vmul.f32 %v2085_v33, %v3714_v38  ;;  %v2034_v49 = vadd.f32 0.18741608, %v2033_v35 }
 0x88b   : > { %v1982_v29 = vmul.f32 %v1981_v25, %v1957_v47  ;;  %v2021_v31 = vsel %vm2018_vm7, %v2020_v45, %v2016_v61  ;;  %v2047_v26 = vadd.f32 1.0, %v2046_v30  ;;  %v2074_v36 = vadd.f32 0.18741608, %v2073_v46 }
 0x88c   : > { %v2022_v34 = vmul.f32 %v2021_v31, %v1997_v23  ;;  %v2087_v47 = vadd.f32 1.0, %v2086_v20  ;;  %v2035_v39 = vmul.f32 %v2034_v49, %v3708_v14 }
 0x88d   : > { %v2437_v41 = vclamps-f32 %v1982_v29, 1.0  ;;  %2675 = vrcp.f32 %v2047_v26  ;;  %v2075_v51 = vmul.f32 %v2074_v36, %v3714_v38  ;;  %v2059_v11 = vand.u32 2147483648, %v2047_v26 }
 0x88e   : > { %v2438_v42 = vclamps-f32 %v2022_v34, 1.0  ;;  %2677 = vrcp.f32 %v2087_v47  ;;  %v2036_v55 = vadd.f32 1.1283791, %v2035_v39  ;;  %v2057_v57 = vand.u32 2147483647, %v2047_v26 }
 0x88f   : > { %v2105_v43 = vadd.f32 1.0, %v2437_v41  ;;  %v2076_v23 = vadd.f32 1.1283791, %v2075_v51  ;;  %vm2053_vm8 = vweird.f32 %v2047_v26  ;;  %v2099_v62 = vand.u32 2147483648, %v2087_v47 }
 0x890   : > { %v2106_v22 = vadd.f32 1.0, %v2438_v42  ;;  %v2060_v6 = vor.u32 1.1754944e-38, %v2059_v11  ;;  %v2097_v14 = vand.u32 2147483647, %v2087_v47  ;;  %v2037_v7 = vmul.f32 %v2036_v55, %v3698_v17 }
 0x891   : > { %v2109_v48 = vmul.f32 %v2105_v43, %v1937_v40  ;;  %vm2058_vm11 = vcmp.eq.f32.partialorder %v2057_v57, 8.507059e+37  ;;  %vm2093_vm12 = vweird.f32 %v2087_v47  ;;  %v2100_v13 = vor.u32 1.1754944e-38, %v2099_v62 }
 0x892   : > { %v2110_v24 = vmul.f32 %v2106_v22, %v1938_v32  ;;  %v2077_v1 = vmul.f32 %v2076_v23, %v3704_v19  ;;  %vm2098_vm14 = vcmp.eq.f32.partialorder %v2097_v14, 8.507059e+37  ;;  %v2620_v19 = vld [vmem:[%s3859_s26] ss:$0 sm:$0xff] }
 0x893   : > { %2165 = vmatmul.f32.vlgmr.msrb.gmra.mxu2 %v2109_v48  ;;  %v2676_v21 = vpop.eup %2675 }
 0x894   : > { %2188 = vmatmul.f32.vlgmr.msrb.gmra.mxu3 %v2110_v24  ;;  %v2049_v16 = vmul.f32 %v2676_v21, %v2047_v26  ;;  %v2678_v10 = vpop.eup %2677  ;;  %vm2054_vm3 = vweird.f32 %v2676_v21 }
 0x895   : > { %v2089_v54 = vmul.f32 %v2678_v10, %v2087_v47  ;;  %vm2055_vm9 = vmor %vm2053_vm8, %vm2054_vm3  ;;  %vm2094_vm10 = vweird.f32 %v2678_v10 }
 0x896   : > { %v2050_v52 = vsub.f32 1.0, %v2049_v16  ;;  %vm2095_vm13 = vmor %vm2093_vm12, %vm2094_vm10 }
 0x897   : > { %v2090_v58 = vsub.f32 1.0, %v2089_v54 }
 0x898   : > { %v2051_v56 = vmul.f32 %v2676_v21, %v2050_v52 }
 0x899   : > { %v2091_v2 = vmul.f32 %v2678_v10, %v2090_v58 }
 0x89a   : > { %v2052_v59 = vadd.f32 %v2676_v21, %v2051_v56 }
 0x89b   : > { %v2092_v3 = vadd.f32 %v2678_v10, %v2091_v2 }
 0x89c   : > { %v2056_v38 = vsel %vm2055_vm9, %v2676_v21, %v2052_v59 }
 0x89d   : > { %v2061_v9 = vsel %vm2058_vm11, %v2060_v6, %v2056_v38  ;;  %v2096_v44 = vsel %vm2095_vm13, %v2678_v10, %v2092_v3 }
 0x89e   : > { %v2062_v12 = vmul.f32 %v2061_v9, %v2037_v7  ;;  %v2101_v60 = vsel %vm2098_vm14, %v2100_v13, %v2096_v44 }
 0x89f   : > { %v2102_v4 = vmul.f32 %v2101_v60, %v2077_v1 }
 0x8a0   : > { %v2439_v15 = vclamps-f32 %v2062_v12, 1.0 }
 0x8a1   : > { %v2440_v17 = vclamps-f32 %v2102_v4, 1.0 }
 0x8a2   : > { %v2107_v18 = vadd.f32 1.0, %v2439_v15 }
 0x8a3   : > { %v2108_v25 = vadd.f32 1.0, %v2440_v17 }
 0x8a4   : > { %v2111_v45 = vmul.f32 %v2107_v18, %v1939_v0 }
 0x8a5   : > { %v2112_v61 = vmul.f32 %v2108_v25, %v1940_v8 }
 0x8a6   : > { %2168 = vmatmul.f32.gmra.mxu2 %v2111_v45 }
 0x8a7   : > { %2191 = vmatmul.f32.gmra.mxu3 %v2112_v61 }
 0x916   : > { %v2166_v27 = vpop.f32.mrf.mxu2 }
 0x917   : > { %v2167_v28 = vadd.f32 %v2620_v19, %v2166_v27  ;;  %v2189_v29 = vpop.f32.mrf.mxu3 }
 0x919   : > { %v2190_v31 = vadd.f32 %v2189_v29, %v2167_v28 }
 0x91b   : > { %v2195_v63 = vadd.f32 %v2190_v31, %v3616_v50 }
 0x91d   : > { %2197 = vst [vmem:[%s751_s6] sm:$0xff] %v2195_v63 }
 0x929   : > { %v2169_v5 = vpop.f32.mrf.mxu2 }
 0x92a   : > { %v2170_v30 = vadd.f32 %v2620_v19, %v2169_v5  ;;  %v2192_v34 = vpop.f32.mrf.mxu3 }
 0x92c   : > { %v2193_v37 = vadd.f32 %v2192_v34, %v2170_v30 }
 0x92e   : > { %v2196_v33 = vadd.f32 %v2193_v37, %v3620_v53 }
 0x930   : > { %2198 = vst [vmem:[%s751_s6 + $0x8] sm:$0xff] %v2196_v33 }
 0x931   : > { %2978 = shalt.err (!%p2975_p8)
}
 0x932   : > { %s3054_s14 = smov 128   ;;  %s3055_s29 = smov 8  }
 0x933   : > { %2482 = dma.vmem_to_hbm [thread:$0]  (%p3266_p0), %s2213_s21, 256, %s2215_s22, %s2200_s15, %s3054_s14, %s3054_s14, %s3055_s29  }
 0x934 PF: > { %s3862_s0 = sld [smem:[#allocation26_spill]]  ;;  %p3864_p10 = scmp.ge.s32.totalorder %s3037_s30, 2 }
 0x936   : > { %p2514_p11 = pnand %p3864_p10, %p3274_p6 }
 0x938   : > { %p2515_p12 = pneg %p2514_p11 }
 0x93a   : > { %s2229_s6 = sand.u32 1, %s3862_s0  }
 0x93b   : > { %s2230_s3 = scalar_lea.sflag [#allocation5], %s2229_s6 }
 0x93c   : > { %3020 = dma.done.wait (%p2515_p12), %s2230_s3, 256  }
 0x93d   : > { %3022 = vsyncadd (%p2515_p12), %s2230_s3, 4294967040  ;;  %s3865_s30 = sld [smem:[#allocation28_spill]]  ;;  %s3868_s27 = smov %s3029_s28 }
 0x93e   : > { %s3866_s10 = sld [smem:[#allocation27_spill]] }
 0x93f   : > { %s3867_s29 = sld [smem:[#allocation29_spill]] }
 0x943   : > { %p37_p2 = scmp.ge.s32.totalorder %s3865_s30, 4  }
 0x944   : > { %s3869_s28 = smov %s3866_s10 }
 0x945   :  { %39 = sbr.rel (!%p37_p2) target bundleno = 24 (0x18), region = 178 }
 0x94a   :  { %2236 = vsyncpa [#allocation4], 1 }
 0x94b   :  { %2238 = vsyncpa [#allocation4 + $0x1], 1 }
 0x94c   :  { %2239 = vsyncpa [#allocation7], 1 }
 0x94d   :  { %2241 = vsyncpa [#allocation7 + $0x1], 1 }
 0x94e   :  { %2242 = vsyncpa [#allocation10], 1 }
 0x94f   :  { %2243 = vsyncpa [#allocation13], 1 }
 0x950   :  { %2244 = vsyncpa [#allocation16], 1 }
 0x951   :  { %2245 = vsyncpa [#allocation5], 1 }
 0x952   :  { %2247 = vsyncpa [#allocation5 + $0x1], 1 }

</bundles_post_ra>
